<compile_context>
chip_gen: v5e
topology: v5e:2x2
jax: 0.10.0
libtpu: 0.0.40
codegen_flags: <defaults>
</compile_context>

<pallas_src>
import functools

import jax
import jax.numpy as jnp
import numpy as np
from jax.experimental import pallas as pl
from jax.experimental.pallas import tpu as pltpu

HIDDEN = [128, 100, 100, 100]   # module default
D_PAD = 128                     # all features padded to the 128-lane width
N_FEAT = HIDDEN[-1]             # 100 real features in every hidden layer
SUM_COL = N_FEAT                # spare lane carrying the MXU-computed row-sum sum_j y[:, j]
LN_EPS = 1e-5


def _round_up(x, m):
    return (x + m - 1) // m * m


def _cdiv(a, b):
    return (a + b - 1) // b


def _mlp_kernel(x_ref,
                w0_ref, b0_ref, g0_ref, be0_ref,
                w1_ref, b1_ref, g1_ref, be1_ref,
                w2_ref, b2_ref, g2_ref, be2_ref,
                wf_ref, bf_ref,
                o_ref):
    """Fused 3x(Linear -> LayerNorm -> ReLU) + final Linear(->1) on one batch tile."""
    lane = jax.lax.broadcasted_iota(jnp.int32, (1, D_PAD), 1)
    feat_mask = lane < N_FEAT          # real-feature lanes (excludes SUM_COL and pad lanes)
    inv_n = 1.0 / N_FEAT

    def layer(h, w_ref, b_ref, g_ref, be_ref):
        # Linear (MXU): bf16 operands (stored bf16 in HBM), f32 accumulation.
        # Pad lanes (>100) of w/b are zero; lane SUM_COL of w holds W@1 and of b holds
        # sum(b), so y[:, SUM_COL] == sum_j y[:, j] comes out of the MXU for free.
        y = jnp.dot(h, w_ref[...], preferred_element_type=jnp.float32) + b_ref[...]
        s1 = y[:, SUM_COL:SUM_COL + 1]                    # MXU-provided sum over real lanes
        yy = jnp.where(feat_mask, y * y, 0.0)             # exclude SUM_COL / pad lanes
        s2 = jnp.sum(yy, axis=-1, keepdims=True)          # single XLU lane reduction
        mu = s1 * inv_n
        var = jnp.maximum(s2 * inv_n - mu * mu, 0.0)
        yn = (y - mu) * jax.lax.rsqrt(var + LN_EPS)
        # gamma = 0 on SUM_COL and pad lanes -> those lanes are exactly 0 again.
        yn = yn * g_ref[...] + be_ref[...]
        # ReLU (Dropout is identity in eval); cast to bf16 = next matmul's LHS dtype.
        return jnp.maximum(yn, 0.0).astype(jnp.bfloat16)

    h = layer(x_ref[...], w0_ref, b0_ref, g0_ref, be0_ref)
    h = layer(h, w1_ref, b1_ref, g1_ref, be1_ref)
    h = layer(h, w2_ref, b2_ref, g2_ref, be2_ref)
    # fc_final: contract the feature dims of wf (1,128) and h (tile,128) so the result is
    # produced lane-dense as (1, tile) and stored with unmasked full-lane vst.
    out = jax.lax.dot_general(wf_ref[...], h, (((1,), (1,)), ((), ())),
                              preferred_element_type=jnp.float32)
    o_ref[...] = (out + bf_ref[...]).astype(o_ref.dtype)


@functools.partial(jax.jit, static_argnames=("tile_b",))
def mtl_mlp_forward(x, params, tile_b=1024):
    """x: (B, 128) float32 or bfloat16. params: flat tuple from init_params()[0].

    Returns (B, 1) float32.
    """
    B, D_in = x.shape
    assert D_in == HIDDEN[0] == D_PAD
    if x.dtype != jnp.bfloat16:
        # Prefer passing x already in bf16: the MXU rounds operands to bf16 anyway and a
        # bf16 input halves the kernel's dominant HBM read.
        x = x.astype(jnp.bfloat16)

    # Batch tile: big (amortize the ~0.35us/step pipeline overhead) but clamped so the
    # "parallel" batch grid has >= 2 steps whenever B > 128, keeping both v7x TensorCores
    # busy. No divisibility requirement: the last x block may be partial (Pallas clips it).
    tile = min(_round_up(tile_b, 128), _round_up(_cdiv(B, 2), 128))
    grid_n = _cdiv(B, tile)
    out_cols = grid_n * tile   # whole output blocks only -> no partial/masked output stores

    def _const_spec(p):
        # Whole-array block, same block index every step: weights stay VMEM-resident
        # (Pallas does not re-DMA blocks whose index does not change).
        return pl.BlockSpec(p.shape, lambda i: (0, 0))

    in_specs = [pl.BlockSpec((tile, D_PAD), lambda i: (i, 0))]
    in_specs += [_const_spec(p) for p in params]
    out_specs = pl.BlockSpec((1, tile), lambda i: (0, i))   # lane-dense output slab

    out = pl.pallas_call(
        _mlp_kernel,
        out_shape=jax.ShapeDtypeStruct((1, out_cols), jnp.float32),
        grid=(grid_n,),
        in_specs=in_specs,
        out_specs=out_specs,
        compiler_params=pltpu.CompilerParams(
            dimension_semantics=("parallel",)),
    )(x, *params)

    return out[0, :B][:, None]


def init_params(key):
    """Deterministic synthetic parameters matching the module's shapes.

    Returns (kernel_params, ref_params):
      kernel_params: flat tuple (w0,b0,g0,be0, w1,b1,g1,be1, w2,b2,g2,be2, wf,bf)
        - Linear weights transposed & zero-padded to (128, 128), stored bf16; lane SUM_COL
          holds the row-sums W@1 (the bias lane SUM_COL holds sum(b)).
        - bias / LN gamma / LN beta as (1, 128) f32, gamma = 0 on SUM_COL and pad lanes.
        - wf as a (1, 128) bf16 row, bf as (1, 1) f32.
      ref_params: original unpadded f32 parameters for the pure-JAX reference.
    """
    kernel_params = []
    ref_layers = []
    for i in range(len(HIDDEN) - 1):
        fan_in, fan_out = HIDDEN[i], HIDDEN[i + 1]
        key, kw, kb = jax.random.split(key, 3)
        bound = 1.0 / np.sqrt(fan_in)
        w = jax.random.uniform(kw, (fan_in, fan_out), jnp.float32, -bound, bound)
        b = jax.random.uniform(kb, (fan_out,), jnp.float32, -bound, bound)
        g = jnp.ones((fan_out,), jnp.float32)
        be = jnp.zeros((fan_out,), jnp.float32)
        ref_layers.append((w, b, g, be))

        w_p = jnp.zeros((D_PAD, D_PAD), jnp.float32)
        w_p = w_p.at[:fan_in, :fan_out].set(w)
        w_p = w_p.at[:fan_in, SUM_COL].set(jnp.sum(w, axis=1))       # W @ 1 -> free sum_j y
        b_p = jnp.zeros((1, D_PAD), jnp.float32)
        b_p = b_p.at[0, :fan_out].set(b).at[0, SUM_COL].set(jnp.sum(b))
        g_p = jnp.zeros((1, D_PAD), jnp.float32).at[0, :fan_out].set(g)
        be_p = jnp.zeros((1, D_PAD), jnp.float32).at[0, :fan_out].set(be)
        kernel_params += [w_p.astype(jnp.bfloat16), b_p, g_p, be_p]

    # fc_final: Linear(hidden[-1] -> 1)
    fan_in = HIDDEN[-1]
    key, kw, kb = jax.random.split(key, 3)
    bound = 1.0 / np.sqrt(fan_in)
    wf = jax.random.uniform(kw, (fan_in, 1), jnp.float32, -bound, bound)
    bf = jax.random.uniform(kb, (1,), jnp.float32, -bound, bound)
    wf_p = jnp.zeros((1, D_PAD), jnp.float32).at[0, :fan_in].set(wf[:, 0]).astype(jnp.bfloat16)
    bf_p = bf.reshape(1, 1)
    kernel_params += [wf_p, bf_p]
    return tuple(kernel_params), (ref_layers, (wf, bf))


def reference_forward(x, ref_params):
    """Pure-JAX f32 reference of the original (unpadded) forward pass."""
    ref_layers, (wf, bf) = ref_params
    h = x
    for (w, b, g, be) in ref_layers:
        y = h @ w + b
        mu = jnp.mean(y, axis=-1, keepdims=True)
        var = jnp.mean((y - mu) ** 2, axis=-1, keepdims=True)
        h = jnp.maximum((y - mu) / jnp.sqrt(var + LN_EPS) * g + be, 0.0)
    return h @ wf + bf            # (B, 1)


if __name__ == "__main__":
    key = jax.random.PRNGKey(0)
    key, kx1, kx2, kp = jax.random.split(key, 4)
    params, ref_params = init_params(kp)

    # bf16 MXU operands -> loosen tolerance vs. the f32 reference.
    RTOL, ATOL = 5e-2, 5e-2

    # Case 1: small batch, single grid step, partial (clipped) x block; f32 input path
    # (wrapper casts to bf16).
    B1 = 24
    x1 = jax.random.normal(kx1, (B1, HIDDEN[0]), jnp.float32)
    out1 = jax.block_until_ready(mtl_mlp_forward(x1, params))
    ref1 = reference_forward(x1.astype(jnp.bfloat16).astype(jnp.float32), ref_params)
    assert out1.shape == (B1, 1)
    np.testing.assert_allclose(np.asarray(out1), np.asarray(ref1), rtol=RTOL, atol=ATOL)

    # Case 2: batch not a multiple of the tile -> multi-step "parallel" grid with a clipped
    # final x block (no jnp.pad); bf16 input path (no wrapper cast).
    B2 = 200
    x2 = jax.random.normal(kx2, (B2, HIDDEN[0]), jnp.float32).astype(jnp.bfloat16)
    out2 = jax.block_until_ready(mtl_mlp_forward(x2, params, tile_b=256))
    ref2 = reference_forward(x2.astype(jnp.float32), ref_params)
    assert out2.shape == (B2, 1)
    np.testing.assert_allclose(np.asarray(out2), np.asarray(ref2), rtol=RTOL, atol=ATOL)

    print("KERNEL_OK")
</pallas_src>

<mosaic_0001>
module attributes {stable_mosaic.version = 11 : i64} {
  func.func @_mlp_kernel(%arg0: i32, %arg1: memref<128x128xbf16, #tpu.memory_space<vmem>>, %arg2: memref<128x128xbf16, #tpu.memory_space<vmem>>, %arg3: memref<1x128xf32, #tpu.memory_space<vmem>>, %arg4: memref<1x128xf32, #tpu.memory_space<vmem>>, %arg5: memref<1x128xf32, #tpu.memory_space<vmem>>, %arg6: memref<128x128xbf16, #tpu.memory_space<vmem>>, %arg7: memref<1x128xf32, #tpu.memory_space<vmem>>, %arg8: memref<1x128xf32, #tpu.memory_space<vmem>>, %arg9: memref<1x128xf32, #tpu.memory_space<vmem>>, %arg10: memref<128x128xbf16, #tpu.memory_space<vmem>>, %arg11: memref<1x128xf32, #tpu.memory_space<vmem>>, %arg12: memref<1x128xf32, #tpu.memory_space<vmem>>, %arg13: memref<1x128xf32, #tpu.memory_space<vmem>>, %arg14: memref<1x128xbf16, #tpu.memory_space<vmem>>, %arg15: memref<1x1xf32, #tpu.memory_space<vmem>>, %arg16: memref<1x128xf32, #tpu.memory_space<vmem>>) attributes {dimension_semantics = [#tpu.dimension_semantics<parallel>], iteration_bounds = array<i64: 1>, scalar_prefetch = 0 : i64, scratch_operands = 0 : i64, tpu.core_type = #tpu.core_type<tc>, window_params = [{transform_indices = @transform_0, window_bounds = array<i64: 128, 128>}, {pipeline_mode = #tpu.pipeline_mode<synchronous>, transform_indices = @transform_1, window_bounds = array<i64: 128, 128>}, {pipeline_mode = #tpu.pipeline_mode<synchronous>, transform_indices = @transform_2, window_bounds = array<i64: 1, 128>}, {pipeline_mode = #tpu.pipeline_mode<synchronous>, transform_indices = @transform_3, window_bounds = array<i64: 1, 128>}, {pipeline_mode = #tpu.pipeline_mode<synchronous>, transform_indices = @transform_4, window_bounds = array<i64: 1, 128>}, {pipeline_mode = #tpu.pipeline_mode<synchronous>, transform_indices = @transform_5, window_bounds = array<i64: 128, 128>}, {pipeline_mode = #tpu.pipeline_mode<synchronous>, transform_indices = @transform_6, window_bounds = array<i64: 1, 128>}, {pipeline_mode = #tpu.pipeline_mode<synchronous>, transform_indices = @transform_7, window_bounds = array<i64: 1, 128>}, {pipeline_mode = #tpu.pipeline_mode<synchronous>, transform_indices = @transform_8, window_bounds = array<i64: 1, 128>}, {pipeline_mode = #tpu.pipeline_mode<synchronous>, transform_indices = @transform_9, window_bounds = array<i64: 128, 128>}, {pipeline_mode = #tpu.pipeline_mode<synchronous>, transform_indices = @transform_10, window_bounds = array<i64: 1, 128>}, {pipeline_mode = #tpu.pipeline_mode<synchronous>, transform_indices = @transform_11, window_bounds = array<i64: 1, 128>}, {pipeline_mode = #tpu.pipeline_mode<synchronous>, transform_indices = @transform_12, window_bounds = array<i64: 1, 128>}, {pipeline_mode = #tpu.pipeline_mode<synchronous>, transform_indices = @transform_13, window_bounds = array<i64: 1, 128>}, {pipeline_mode = #tpu.pipeline_mode<synchronous>, transform_indices = @transform_14, window_bounds = array<i64: 1, 1>}, {transform_indices = @transform_15, window_bounds = array<i64: 1, 128>}]} {
    %0 = tpu.iota {dimensions = array<i32: 1>} : vector<1x128xi32>
    %c100_i32 = arith.constant 100 : i32
    %1 = vector.broadcast %c100_i32 : i32 to vector<1x128xi32>
    %2 = arith.cmpi slt, %0, %1 : vector<1x128xi32>
    %c0 = arith.constant 0 : index
    %c0_0 = arith.constant 0 : index
    %3 = vector.load %arg1[%c0, %c0_0] : memref<128x128xbf16, #tpu.memory_space<vmem>>, vector<128x128xbf16>
    %c0_1 = arith.constant 0 : index
    %c0_2 = arith.constant 0 : index
    %4 = vector.load %arg2[%c0_1, %c0_2] : memref<128x128xbf16, #tpu.memory_space<vmem>>, vector<128x128xbf16>
    %cst = arith.constant dense<0.000000e+00> : vector<128x128xf32>
    %5 = tpu.matmul %3, %4, %cst {dimension_numbers = #tpu.dot_dimension_numbers<[1], [0], [0], [1], [0, 0, 1, 1], [], []>} : vector<128x128xbf16>, vector<128x128xbf16>, vector<128x128xf32> -> vector<128x128xf32>
    %c0_3 = arith.constant 0 : index
    %c0_4 = arith.constant 0 : index
    %6 = vector.load %arg3[%c0_3, %c0_4] : memref<1x128xf32, #tpu.memory_space<vmem>>, vector<1x128xf32>
    %7 = vector.broadcast %6 : vector<1x128xf32> to vector<128x128xf32>
    %8 = arith.addf %5, %7 : vector<128x128xf32>
    %9 = vector.extract_strided_slice %8 {offsets = [0, 100], sizes = [128, 1], strides = [1, 1]} : vector<128x128xf32> to vector<128x1xf32>
    %10 = arith.mulf %8, %8 : vector<128x128xf32>
    %cst_5 = arith.constant 0.000000e+00 : f32
    %11 = vector.shape_cast %2 : vector<1x128xi1> to vector<1x128xi1>
    %12 = vector.broadcast %11 : vector<1x128xi1> to vector<128x128xi1>
    %13 = vector.broadcast %cst_5 : f32 to vector<128x128xf32>
    %14 = arith.select %12, %10, %13 : vector<128x128xi1>, vector<128x128xf32>
    %cst_6 = arith.constant dense<0.000000e+00> : vector<128xf32>
    %15 = vector.multi_reduction <add>, %14, %cst_6 [1] : vector<128x128xf32> to vector<128xf32>
    %16 = vector.shape_cast %15 : vector<128xf32> to vector<128x1xf32>
    %cst_7 = arith.constant 0.00999999977 : f32
    %17 = vector.broadcast %cst_7 : f32 to vector<128x1xf32>
    %18 = arith.mulf %9, %17 : vector<128x1xf32>
    %cst_8 = arith.constant 0.00999999977 : f32
    %19 = vector.broadcast %cst_8 : f32 to vector<128x1xf32>
    %20 = arith.mulf %16, %19 : vector<128x1xf32>
    %21 = arith.mulf %18, %18 : vector<128x1xf32>
    %22 = arith.subf %20, %21 : vector<128x1xf32>
    %cst_9 = arith.constant 0.000000e+00 : f32
    %23 = vector.broadcast %cst_9 : f32 to vector<128x1xf32>
    %24 = arith.maximumf %22, %23 : vector<128x1xf32>
    %25 = vector.broadcast %18 : vector<128x1xf32> to vector<128x128xf32>
    %26 = arith.subf %8, %25 : vector<128x128xf32>
    %cst_10 = arith.constant 9.99999974E-6 : f32
    %27 = vector.broadcast %cst_10 : f32 to vector<128x1xf32>
    %28 = arith.addf %24, %27 : vector<128x1xf32>
    %29 = math.rsqrt %28 : vector<128x1xf32>
    %30 = vector.broadcast %29 : vector<128x1xf32> to vector<128x128xf32>
    %31 = arith.mulf %26, %30 : vector<128x128xf32>
    %c0_11 = arith.constant 0 : index
    %c0_12 = arith.constant 0 : index
    %32 = vector.load %arg4[%c0_11, %c0_12] : memref<1x128xf32, #tpu.memory_space<vmem>>, vector<1x128xf32>
    %33 = vector.broadcast %32 : vector<1x128xf32> to vector<128x128xf32>
    %34 = arith.mulf %31, %33 : vector<128x128xf32>
    %c0_13 = arith.constant 0 : index
    %c0_14 = arith.constant 0 : index
    %35 = vector.load %arg5[%c0_13, %c0_14] : memref<1x128xf32, #tpu.memory_space<vmem>>, vector<1x128xf32>
    %36 = vector.broadcast %35 : vector<1x128xf32> to vector<128x128xf32>
    %37 = arith.addf %34, %36 : vector<128x128xf32>
    %cst_15 = arith.constant 0.000000e+00 : f32
    %38 = vector.broadcast %cst_15 : f32 to vector<128x128xf32>
    %39 = arith.maximumf %37, %38 : vector<128x128xf32>
    %40 = arith.truncf %39 : vector<128x128xf32> to vector<128x128xbf16>
    %c0_16 = arith.constant 0 : index
    %c0_17 = arith.constant 0 : index
    %41 = vector.load %arg6[%c0_16, %c0_17] : memref<128x128xbf16, #tpu.memory_space<vmem>>, vector<128x128xbf16>
    %cst_18 = arith.constant dense<0.000000e+00> : vector<128x128xf32>
    %42 = tpu.matmul %40, %41, %cst_18 {dimension_numbers = #tpu.dot_dimension_numbers<[1], [0], [0], [1], [0, 0, 1, 1], [], []>} : vector<128x128xbf16>, vector<128x128xbf16>, vector<128x128xf32> -> vector<128x128xf32>
    %c0_19 = arith.constant 0 : index
    %c0_20 = arith.constant 0 : index
    %43 = vector.load %arg7[%c0_19, %c0_20] : memref<1x128xf32, #tpu.memory_space<vmem>>, vector<1x128xf32>
    %44 = vector.broadcast %43 : vector<1x128xf32> to vector<128x128xf32>
    %45 = arith.addf %42, %44 : vector<128x128xf32>
    %46 = vector.extract_strided_slice %45 {offsets = [0, 100], sizes = [128, 1], strides = [1, 1]} : vector<128x128xf32> to vector<128x1xf32>
    %47 = arith.mulf %45, %45 : vector<128x128xf32>
    %cst_21 = arith.constant 0.000000e+00 : f32
    %48 = vector.shape_cast %2 : vector<1x128xi1> to vector<1x128xi1>
    %49 = vector.broadcast %48 : vector<1x128xi1> to vector<128x128xi1>
    %50 = vector.broadcast %cst_21 : f32 to vector<128x128xf32>
    %51 = arith.select %49, %47, %50 : vector<128x128xi1>, vector<128x128xf32>
    %cst_22 = arith.constant dense<0.000000e+00> : vector<128xf32>
    %52 = vector.multi_reduction <add>, %51, %cst_22 [1] : vector<128x128xf32> to vector<128xf32>
    %53 = vector.shape_cast %52 : vector<128xf32> to vector<128x1xf32>
    %cst_23 = arith.constant 0.00999999977 : f32
    %54 = vector.broadcast %cst_23 : f32 to vector<128x1xf32>
    %55 = arith.mulf %46, %54 : vector<128x1xf32>
    %cst_24 = arith.constant 0.00999999977 : f32
    %56 = vector.broadcast %cst_24 : f32 to vector<128x1xf32>
    %57 = arith.mulf %53, %56 : vector<128x1xf32>
    %58 = arith.mulf %55, %55 : vector<128x1xf32>
    %59 = arith.subf %57, %58 : vector<128x1xf32>
    %cst_25 = arith.constant 0.000000e+00 : f32
    %60 = vector.broadcast %cst_25 : f32 to vector<128x1xf32>
    %61 = arith.maximumf %59, %60 : vector<128x1xf32>
    %62 = vector.broadcast %55 : vector<128x1xf32> to vector<128x128xf32>
    %63 = arith.subf %45, %62 : vector<128x128xf32>
    %cst_26 = arith.constant 9.99999974E-6 : f32
    %64 = vector.broadcast %cst_26 : f32 to vector<128x1xf32>
    %65 = arith.addf %61, %64 : vector<128x1xf32>
    %66 = math.rsqrt %65 : vector<128x1xf32>
    %67 = vector.broadcast %66 : vector<128x1xf32> to vector<128x128xf32>
    %68 = arith.mulf %63, %67 : vector<128x128xf32>
    %c0_27 = arith.constant 0 : index
    %c0_28 = arith.constant 0 : index
    %69 = vector.load %arg8[%c0_27, %c0_28] : memref<1x128xf32, #tpu.memory_space<vmem>>, vector<1x128xf32>
    %70 = vector.broadcast %69 : vector<1x128xf32> to vector<128x128xf32>
    %71 = arith.mulf %68, %70 : vector<128x128xf32>
    %c0_29 = arith.constant 0 : index
    %c0_30 = arith.constant 0 : index
    %72 = vector.load %arg9[%c0_29, %c0_30] : memref<1x128xf32, #tpu.memory_space<vmem>>, vector<1x128xf32>
    %73 = vector.broadcast %72 : vector<1x128xf32> to vector<128x128xf32>
    %74 = arith.addf %71, %73 : vector<128x128xf32>
    %cst_31 = arith.constant 0.000000e+00 : f32
    %75 = vector.broadcast %cst_31 : f32 to vector<128x128xf32>
    %76 = arith.maximumf %74, %75 : vector<128x128xf32>
    %77 = arith.truncf %76 : vector<128x128xf32> to vector<128x128xbf16>
    %c0_32 = arith.constant 0 : index
    %c0_33 = arith.constant 0 : index
    %78 = vector.load %arg10[%c0_32, %c0_33] : memref<128x128xbf16, #tpu.memory_space<vmem>>, vector<128x128xbf16>
    %cst_34 = arith.constant dense<0.000000e+00> : vector<128x128xf32>
    %79 = tpu.matmul %77, %78, %cst_34 {dimension_numbers = #tpu.dot_dimension_numbers<[1], [0], [0], [1], [0, 0, 1, 1], [], []>} : vector<128x128xbf16>, vector<128x128xbf16>, vector<128x128xf32> -> vector<128x128xf32>
    %c0_35 = arith.constant 0 : index
    %c0_36 = arith.constant 0 : index
    %80 = vector.load %arg11[%c0_35, %c0_36] : memref<1x128xf32, #tpu.memory_space<vmem>>, vector<1x128xf32>
    %81 = vector.broadcast %80 : vector<1x128xf32> to vector<128x128xf32>
    %82 = arith.addf %79, %81 : vector<128x128xf32>
    %83 = vector.extract_strided_slice %82 {offsets = [0, 100], sizes = [128, 1], strides = [1, 1]} : vector<128x128xf32> to vector<128x1xf32>
    %84 = arith.mulf %82, %82 : vector<128x128xf32>
    %cst_37 = arith.constant 0.000000e+00 : f32
    %85 = vector.shape_cast %2 : vector<1x128xi1> to vector<1x128xi1>
    %86 = vector.broadcast %85 : vector<1x128xi1> to vector<128x128xi1>
    %87 = vector.broadcast %cst_37 : f32 to vector<128x128xf32>
    %88 = arith.select %86, %84, %87 : vector<128x128xi1>, vector<128x128xf32>
    %cst_38 = arith.constant dense<0.000000e+00> : vector<128xf32>
    %89 = vector.multi_reduction <add>, %88, %cst_38 [1] : vector<128x128xf32> to vector<128xf32>
    %90 = vector.shape_cast %89 : vector<128xf32> to vector<128x1xf32>
    %cst_39 = arith.constant 0.00999999977 : f32
    %91 = vector.broadcast %cst_39 : f32 to vector<128x1xf32>
    %92 = arith.mulf %83, %91 : vector<128x1xf32>
    %cst_40 = arith.constant 0.00999999977 : f32
    %93 = vector.broadcast %cst_40 : f32 to vector<128x1xf32>
    %94 = arith.mulf %90, %93 : vector<128x1xf32>
    %95 = arith.mulf %92, %92 : vector<128x1xf32>
    %96 = arith.subf %94, %95 : vector<128x1xf32>
    %cst_41 = arith.constant 0.000000e+00 : f32
    %97 = vector.broadcast %cst_41 : f32 to vector<128x1xf32>
    %98 = arith.maximumf %96, %97 : vector<128x1xf32>
    %99 = vector.broadcast %92 : vector<128x1xf32> to vector<128x128xf32>
    %100 = arith.subf %82, %99 : vector<128x128xf32>
    %cst_42 = arith.constant 9.99999974E-6 : f32
    %101 = vector.broadcast %cst_42 : f32 to vector<128x1xf32>
    %102 = arith.addf %98, %101 : vector<128x1xf32>
    %103 = math.rsqrt %102 : vector<128x1xf32>
    %104 = vector.broadcast %103 : vector<128x1xf32> to vector<128x128xf32>
    %105 = arith.mulf %100, %104 : vector<128x128xf32>
    %c0_43 = arith.constant 0 : index
    %c0_44 = arith.constant 0 : index
    %106 = vector.load %arg12[%c0_43, %c0_44] : memref<1x128xf32, #tpu.memory_space<vmem>>, vector<1x128xf32>
    %107 = vector.broadcast %106 : vector<1x128xf32> to vector<128x128xf32>
    %108 = arith.mulf %105, %107 : vector<128x128xf32>
    %c0_45 = arith.constant 0 : index
    %c0_46 = arith.constant 0 : index
    %109 = vector.load %arg13[%c0_45, %c0_46] : memref<1x128xf32, #tpu.memory_space<vmem>>, vector<1x128xf32>
    %110 = vector.broadcast %109 : vector<1x128xf32> to vector<128x128xf32>
    %111 = arith.addf %108, %110 : vector<128x128xf32>
    %cst_47 = arith.constant 0.000000e+00 : f32
    %112 = vector.broadcast %cst_47 : f32 to vector<128x128xf32>
    %113 = arith.maximumf %111, %112 : vector<128x128xf32>
    %114 = arith.truncf %113 : vector<128x128xf32> to vector<128x128xbf16>
    %c0_48 = arith.constant 0 : index
    %c0_49 = arith.constant 0 : index
    %115 = vector.load %arg14[%c0_48, %c0_49] : memref<1x128xbf16, #tpu.memory_space<vmem>>, vector<1x128xbf16>
    %cst_50 = arith.constant dense<0.000000e+00> : vector<1x128xf32>
    %116 = tpu.matmul %115, %114, %cst_50 {dimension_numbers = #tpu.dot_dimension_numbers<[1], [1], [0], [0], [0, 0, 1, 0], [], []>} : vector<1x128xbf16>, vector<128x128xbf16>, vector<1x128xf32> -> vector<1x128xf32>
    %c0_51 = arith.constant 0 : index
    %c0_52 = arith.constant 0 : index
    %117 = vector.load %arg15[%c0_51, %c0_52] : memref<1x1xf32, #tpu.memory_space<vmem>>, vector<1x1xf32>
    %118 = vector.broadcast %117 : vector<1x1xf32> to vector<1x128xf32>
    %119 = arith.addf %116, %118 : vector<1x128xf32>
    %c0_53 = arith.constant 0 : index
    %c0_54 = arith.constant 0 : index
    %120 = vector.load %arg16[%c0_53, %c0_54] : memref<1x128xf32, #tpu.memory_space<vmem>>, vector<1x128xf32>
    tpu.vector_store %arg16[%c0_53, %c0_54], %119 {strides = array<i32>} : memref<1x128xf32, #tpu.memory_space<vmem>>, vector<1x128xf32>,
    return
  }
  func.func @transform_0(%arg0: i32) -> (i32, i32) {
    %c0_i32 = arith.constant 0 : i32
    %c0_i32_0 = arith.constant 0 : i32
    return %arg0, %c0_i32 : i32, i32
  }
  func.func @transform_1(%arg0: i32) -> (i32, i32) {
    %c0_i32 = arith.constant 0 : i32
    %c0_i32_0 = arith.constant 0 : i32
    %c0_i32_1 = arith.constant 0 : i32
    return %c0_i32, %c0_i32_0 : i32, i32
  }
  func.func @transform_2(%arg0: i32) -> (i32, i32) {
    %c0_i32 = arith.constant 0 : i32
    %c0_i32_0 = arith.constant 0 : i32
    %c0_i32_1 = arith.constant 0 : i32
    return %c0_i32, %c0_i32_0 : i32, i32
  }
  func.func @transform_3(%arg0: i32) -> (i32, i32) {
    %c0_i32 = arith.constant 0 : i32
    %c0_i32_0 = arith.constant 0 : i32
    %c0_i32_1 = arith.constant 0 : i32
    return %c0_i32, %c0_i32_0 : i32, i32
  }
  func.func @transform_4(%arg0: i32) -> (i32, i32) {
    %c0_i32 = arith.constant 0 : i32
    %c0_i32_0 = arith.constant 0 : i32
    %c0_i32_1 = arith.constant 0 : i32
    return %c0_i32, %c0_i32_0 : i32, i32
  }
  func.func @transform_5(%arg0: i32) -> (i32, i32) {
    %c0_i32 = arith.constant 0 : i32
    %c0_i32_0 = arith.constant 0 : i32
    %c0_i32_1 = arith.constant 0 : i32
    return %c0_i32, %c0_i32_0 : i32, i32
  }
  func.func @transform_6(%arg0: i32) -> (i32, i32) {
    %c0_i32 = arith.constant 0 : i32
    %c0_i32_0 = arith.constant 0 : i32
    %c0_i32_1 = arith.constant 0 : i32
    return %c0_i32, %c0_i32_0 : i32, i32
  }
  func.func @transform_7(%arg0: i32) -> (i32, i32) {
    %c0_i32 = arith.constant 0 : i32
    %c0_i32_0 = arith.constant 0 : i32
    %c0_i32_1 = arith.constant 0 : i32
    return %c0_i32, %c0_i32_0 : i32, i32
  }
  func.func @transform_8(%arg0: i32) -> (i32, i32) {
    %c0_i32 = arith.constant 0 : i32
    %c0_i32_0 = arith.constant 0 : i32
    %c0_i32_1 = arith.constant 0 : i32
    return %c0_i32, %c0_i32_0 : i32, i32
  }
  func.func @transform_9(%arg0: i32) -> (i32, i32) {
    %c0_i32 = arith.constant 0 : i32
    %c0_i32_0 = arith.constant 0 : i32
    %c0_i32_1 = arith.constant 0 : i32
    return %c0_i32, %c0_i32_0 : i32, i32
  }
  func.func @transform_10(%arg0: i32) -> (i32, i32) {
    %c0_i32 = arith.constant 0 : i32
    %c0_i32_0 = arith.constant 0 : i32
    %c0_i32_1 = arith.constant 0 : i32
    return %c0_i32, %c0_i32_0 : i32, i32
  }
  func.func @transform_11(%arg0: i32) -> (i32, i32) {
    %c0_i32 = arith.constant 0 : i32
    %c0_i32_0 = arith.constant 0 : i32
    %c0_i32_1 = arith.constant 0 : i32
    return %c0_i32, %c0_i32_0 : i32, i32
  }
  func.func @transform_12(%arg0: i32) -> (i32, i32) {
    %c0_i32 = arith.constant 0 : i32
    %c0_i32_0 = arith.constant 0 : i32
    %c0_i32_1 = arith.constant 0 : i32
    return %c0_i32, %c0_i32_0 : i32, i32
  }
  func.func @transform_13(%arg0: i32) -> (i32, i32) {
    %c0_i32 = arith.constant 0 : i32
    %c0_i32_0 = arith.constant 0 : i32
    %c0_i32_1 = arith.constant 0 : i32
    return %c0_i32, %c0_i32_0 : i32, i32
  }
  func.func @transform_14(%arg0: i32) -> (i32, i32) {
    %c0_i32 = arith.constant 0 : i32
    %c0_i32_0 = arith.constant 0 : i32
    %c0_i32_1 = arith.constant 0 : i32
    return %c0_i32, %c0_i32_0 : i32, i32
  }
  func.func @transform_15(%arg0: i32) -> (i32, i32) {
    %c0_i32 = arith.constant 0 : i32
    %c0_i32_0 = arith.constant 0 : i32
    return %c0_i32, %arg0 : i32, i32
  }
}

</mosaic_0001>

<bundles_post_ra>
// kernel: mtl_mlp_forward.1
= control target key start
LH: loop header
LB: loop body
LE: loop exit
PB: predicated region body
PF: predicated region fallthrough
CT: control target
= control target key end

     0   :  { %s3679_s0 = inlined_call_operand.vmem [shape: bf16[24,128], index: 0, kind: input, shape index: {}]   ;;  %s3680_s1 = inlined_call_operand.hbm [shape: bf16[128,128], index: 1, kind: input, shape index: {}]   ;;  %s3681_s2 = inlined_call_operand.vmem [shape: f32[1,128], index: 2, kind: input, shape index: {}]   ;;  %s3682_s3 = inlined_call_operand.vmem [shape: f32[1,128], index: 3, kind: input, shape index: {}]   ;;  %s3683_s4 = inlined_call_operand.vmem [shape: f32[1,128], index: 4, kind: input, shape index: {}]   ;;  %s3684_s5 = inlined_call_operand.hbm [shape: bf16[128,128], index: 5, kind: input, shape index: {}]   ;;  %s3685_s6 = inlined_call_operand.vmem [shape: f32[1,128], index: 6, kind: input, shape index: {}]   ;;  %s3686_s7 = inlined_call_operand.vmem [shape: f32[1,128], index: 7, kind: input, shape index: {}]   ;;  %s3687_s8 = inlined_call_operand.vmem [shape: f32[1,128], index: 8, kind: input, shape index: {}]   ;;  %s3688_s9 = inlined_call_operand.hbm [shape: bf16[128,128], index: 9, kind: input, shape index: {}]   ;;  %s3689_s10 = inlined_call_operand.vmem [shape: f32[1,128], index: 10, kind: input, shape index: {}]   ;;  %s3690_s11 = inlined_call_operand.vmem [shape: f32[1,128], index: 11, kind: input, shape index: {}]   ;;  %s3691_s12 = inlined_call_operand.vmem [shape: f32[1,128], index: 12, kind: input, shape index: {}]   ;;  %s3692_s13 = inlined_call_operand.vmem [shape: bf16[1,128], index: 13, kind: input, shape index: {}]   ;;  %s3693_s14 = inlined_call_operand.<no memory space> [shape: f32[1,1], index: 14, kind: input, shape index: {}]   ;;  %s3694_s15 = inlined_call_operand.vmem [shape: f32[1,128], index: 15, kind: output, shape index: {}]  }
   0x1   :  { %v20_v0 = vstv %s3693_s14 }
   0x2   :  { %21 = vst [vmem:[#allocation2] sm:$0x1] %v20_v0 }
   0x3   :  { %22 = vsyncpa [#allocation4], 0 }
   0x4   :  { %23 = vsyncpa [#allocation6], 0  ;;  %s49_s22 = sshll.u32 %s3684_s5, 4  ;;  %s2628_s23 = smov [#allocation5]   ;;  %s50_s22 = int_to_ptr.hbm [resolvable:$true] %s49_s22 }
   0x5   :  { %s51_s24 = sshll.u32 %s2628_s23, 4  ;;  %s30_s27 = sshll.u32 %s3680_s1, 4  ;;  %s52_s24 = int_to_ptr.vmem [resolvable:$true] %s51_s24  ;;  %s31_s27 = int_to_ptr.hbm [resolvable:$true] %s30_s27 }
   0x6   :  { %s2629_s28 = smov 64   ;;  %s2630_s29 = smov 4  }
   0x7   :  { %57 = dma.hbm_to_vmem [thread:$0]  %s50_s22, 1024, %s52_s24, [#allocation6], %s2629_s28, %s2629_s28, %s2630_s29  }
   0x8   :  { %s2631_s14 = smov [#allocation3]   ;;  %s68_s18 = sshll.u32 %s3688_s9, 4  ;;  %s69_s18 = int_to_ptr.hbm [resolvable:$true] %s68_s18 }
   0x9   :  { %s32_s30 = sshll.u32 %s2631_s14, 4  ;;  %s2632_s5 = smov [#allocation7]   ;;  %s33_s30 = int_to_ptr.vmem [resolvable:$true] %s32_s30 }
   0xa   :  { %38 = dma.hbm_to_vmem [thread:$0]  %s31_s27, 1024, %s33_s30, [#allocation4], %s2629_s28, %s2629_s28, %s2630_s29  }
   0xb   :  { %s70_s19 = sshll.u32 %s2632_s5, 4  ;;  %s71_s19 = int_to_ptr.vmem [resolvable:$true] %s70_s19 }
   0xc   :  { %76 = dma.hbm_to_vmem [thread:$0]  %s69_s18, 1024, %s71_s19, [#allocation6], %s2629_s28, %s2629_s28, %s2630_s29  }
   0xd   :  { %2624 = dma.done.wait [#allocation4], 1024  }
   0xe   :  { %2625 = vsyncadd [#allocation4], 4294966272 }
   0xf   :  { %2626 = dma.done.wait [#allocation6], 2048  }
  0x10   :  { %2627 = vsyncadd [#allocation6], 4294965248  ;;  %v2418_v1 = vld [vmem:[#allocation3 + $0x38] sm:$0xff]  ;;  %v2417_v2 = vld [vmem:[#allocation3 + $0x30] sm:$0xff]  ;;  %v2633_v16 = vmov 100   ;;  %v99_v17 = vlaneseq }
  0x11   :  { %234 = vmatpush.bf16.msra.mxu0 %v2418_v1  ;;  %v2416_v3 = vld [vmem:[#allocation3 + $0x28] sm:$0xff]  ;;  %v2415_v4 = vld [vmem:[#allocation3 + $0x20] sm:$0xff]  ;;  %v2414_v5 = vld [vmem:[#allocation3 + $0x18] sm:$0xff]  ;;  %2442 = vset.pattern.permute.xlu1 %v2633_v16 }
  0x12   :  { %v2413_v6 = vld [vmem:[#allocation3 + $0x10] sm:$0xff]  ;;  %v2412_v7 = vld [vmem:[#allocation3 + $0x8] sm:$0xff]  ;;  %v2411_v8 = vld [vmem:[#allocation3] sm:$0xff]  ;;  %2443 = vset.pattern.permute.xlu0 %v2633_v16  ;;  %2444 = vset.pattern.permute.xlu2 %v2633_v16  ;;  %v2753_v19 = vand.u32 127, %v99_v17 }
  0x13   :  { %v2403_v9 = vld [vmem:[%s3679_s0] sm:$0xff]  ;;  %v2404_v10 = vld [vmem:[%s3679_s0 + $0x8] sm:$0xff]  ;;  %v2405_v11 = vld [vmem:[%s3679_s0 + $0x10] sm:$0xff] }
  0x14   :  { %v2406_v12 = vld [vmem:[%s3679_s0 + $0x18] sm:$0xff]  ;;  %v2407_v13 = vld [vmem:[%s3679_s0 + $0x20] sm:$0xff]  ;;  %v2408_v14 = vld [vmem:[%s3679_s0 + $0x28] sm:$0xff]  ;;  %vm101_vm0 = vcmp.lt.s32.totalorder %v2753_v19, 100 }
  0x15   :  { %235 = vmatpush.bf16.msra.mxu0 %v2417_v2  ;;  %v2409_v15 = vld [vmem:[%s3679_s0 + $0x30] sm:$0xff]  ;;  %v2751_v18 = vld [vmem:[%s3681_s2] ss:$0 sm:$0xff]  ;;  %v2410_v48 = vld [vmem:[%s3679_s0 + $0x38] sm:$0xff] }
  0x19   :  { %236 = vmatpush.bf16.msra.mxu0 %v2416_v3 }
  0x1d   :  { %237 = vmatpush.bf16.msra.mxu0 %v2415_v4 }
  0x21   :  { %238 = vmatpush.bf16.msra.mxu0 %v2414_v5 }
  0x25   :  { %239 = vmatpush.bf16.msra.mxu0 %v2413_v6 }
  0x29   :  { %240 = vmatpush.bf16.msra.mxu0 %v2412_v7 }
  0x2d   :  { %241 = vmatpush.bf16.msra.mxu0 %v2411_v8 }
  0x30   :  { %242 = vmatmul.bf16.vlgmr.msra.gmra.mxu0 %v2403_v9 }
  0x40   :  { %247 = vmatmul.bf16.gmra.mxu0 %v2404_v10 }
  0x50   :  { %252 = vmatmul.bf16.gmra.mxu0 %v2405_v11 }
  0x60   :  { %257 = vmatmul.bf16.gmra.mxu0 %v2406_v12 }
  0x70   :  { %262 = vmatmul.bf16.gmra.mxu0 %v2407_v13 }
  0x80   :  { %267 = vmatmul.bf16.gmra.mxu0 %v2408_v14 }
  0x90   :  { %272 = vmatmul.bf16.gmra.mxu0 %v2409_v15 }
  0xa0   :  { %277 = vmatmul.bf16.gmra.mxu0 %v2410_v48 }
  0xad   :  { %v243_v20 = vpop.f32.mrf.mxu0 }
  0xae   :  { %v2756_v21 = vadd.f32 %v2751_v18, %v243_v20 }
  0xb0   :  { %v2760_v22 = vmul.f32 0.01, %v2756_v21  ;;  %v283_v23 = vmul.f32 %v2756_v21, %v2756_v21 }
  0xb2   :  { %431 = vperm.xlu1 %2442, %v2760_v22   ;;  %v301_v24 = vsel %vm101_vm0, %v283_v23, 0.0  ;;  %v381_v17 = vmul.f32 %v2760_v22, %v2760_v22 }
  0xb3   :  { %317 = vadd.xlane.f32.xlu0 %v301_v24 }
  0xb5   :  { %v245_v25 = vpop.f32.mrf.mxu0 }
  0xb6   :  { %v2768_v26 = vadd.f32 %v2751_v18, %v245_v25 }
  0xb8   :  { %v284_v27 = vmul.f32 %v2768_v26, %v2768_v26  ;;  %v350_v24 = vmul.f32 0.01, %v2768_v26 }
  0xba   :  { %v302_v28 = vsel %vm101_vm0, %v284_v27, 0.0 }
  0xbb   :  { %319 = vadd.xlane.f32.xlu0 %v302_v28 }
  0xbd   :  { %v248_v29 = vpop.f32.mrf.mxu0 }
  0xbe   :  { %v2775_v31 = vadd.f32 %v2751_v18, %v248_v29  ;;  %v382_v29 = vmul.f32 %v350_v24, %v350_v24 }
  0xc0   :  { %v2778_v32 = vmul.f32 0.01, %v2775_v31  ;;  %v285_v39 = vmul.f32 %v2775_v31, %v2775_v31 }
  0xc2   :  { %v303_v43 = vsel %vm101_vm0, %v285_v39, 0.0 }
  0xc5   :  { %v250_v30 = vpop.f32.mrf.mxu0 }
  0xc6   :  { %v2798_v42 = vadd.f32 %v2751_v18, %v250_v30 }
  0xc8   :  { %v286_v45 = vmul.f32 %v2798_v42, %v2798_v42 }
  0xca   :  { %v304_v46 = vsel %vm101_vm0, %v286_v45, 0.0 }
  0xcd   :  { %v253_v33 = vpop.f32.mrf.mxu0 }
  0xce   :  { %v2781_v34 = vadd.f32 %v2751_v18, %v253_v33 }
  0xcf   :  { %441 = vperm.xlu0 %2443, %v2778_v32  }
  0xd0   :  { %v287_v35 = vmul.f32 %v2781_v34, %v2781_v34  ;;  %v353_v22 = vmul.f32 0.01, %v2781_v34 }
  0xd2   :  { %v305_v36 = vsel %vm101_vm0, %v287_v35, 0.0 }
  0xd3   :  { %325 = vadd.xlane.f32.xlu2 %v305_v36 }
  0xd5   :  { %v255_v37 = vpop.f32.mrf.mxu0 }
  0xd6   :  { %v2789_v38 = vadd.f32 %v2751_v18, %v255_v37 }
  0xd8   :  { %v288_v40 = vmul.f32 %v2789_v38, %v2789_v38  ;;  %v354_v15 = vmul.f32 0.01, %v2789_v38 }
  0xda   :  { %v306_v41 = vsel %vm101_vm0, %v288_v40, 0.0 }
  0xdb   :  { %327 = vadd.xlane.f32.xlu2 %v306_v41 }
  0xdc   :  { %321 = vadd.xlane.f32.xlu1 %v303_v43 }
  0xdd   :  { %v258_v44 = vpop.f32.mrf.mxu0 }
  0xde   :  { %v2820_v54 = vadd.f32 %v2751_v18, %v258_v44 }
  0xe0   :  { %v289_v57 = vmul.f32 %v2820_v54, %v2820_v54 }
  0xe2   :  { %v307_v60 = vsel %vm101_vm0, %v289_v57, 0.0  ;;  %v352_v57 = vmul.f32 0.01, %v2798_v42 }
  0xe4   :  { %323 = vadd.xlane.f32.xlu1 %v304_v46 }
  0xe5   :  { %v260_v47 = vpop.f32.mrf.mxu0 }
  0xe6   :  { %v2810_v49 = vadd.f32 %v2751_v18, %v260_v47 }
  0xe8   :  { %v290_v50 = vmul.f32 %v2810_v49, %v2810_v49 }
  0xea   :  { %v308_v51 = vsel %vm101_vm0, %v290_v50, 0.0 }
  0xec   :  { %331 = vadd.xlane.f32.xlu1 %v308_v51 }
  0xed   :  { %v263_v52 = vpop.f32.mrf.mxu0 }
  0xee   :  { %v2817_v53 = vadd.f32 %v2751_v18, %v263_v52 }
  0xf0   :  { %v291_v55 = vmul.f32 %v2817_v53, %v2817_v53 }
  0xf2   :  { %v309_v56 = vsel %vm101_vm0, %v291_v55, 0.0 }
  0xf3   :  { %333 = vadd.xlane.f32.xlu2 %v309_v56 }
  0xf5   :  { %v265_v58 = vpop.f32.mrf.mxu0 }
  0xf6   :  { %v2829_v59 = vadd.f32 %v2751_v18, %v265_v58 }
  0xf8   :  { %v292_v61 = vmul.f32 %v2829_v59, %v2829_v59 }
  0xf9   :  { %329 = vadd.xlane.f32.xlu0 %v307_v60 }
  0xfa   :  { %v310_v0 = vsel %vm101_vm0, %v292_v61, 0.0  ;;  %v385_v61 = vmul.f32 %v353_v22, %v353_v22 }
  0xfd   :  { %v268_v62 = vpop.f32.mrf.mxu0 }
  0xfe   :  { %v2836_v63 = vadd.f32 %v2751_v18, %v268_v62 }
 0x100   :  { %v293_v1 = vmul.f32 %v2836_v63, %v2836_v63 }
 0x101   :  { %335 = vadd.xlane.f32.xlu0 %v310_v0 }
 0x102   :  { %v311_v2 = vsel %vm101_vm0, %v293_v1, 0.0  ;;  %v386_v1 = vmul.f32 %v354_v15, %v354_v15 }
 0x103   :  { %337 = vadd.xlane.f32.xlu1 %v311_v2 }
 0x105   :  { %v270_v3 = vpop.f32.mrf.mxu0 }
 0x106   :  { %v2845_v4 = vadd.f32 %v2751_v18, %v270_v3 }
 0x108   :  { %v294_v5 = vmul.f32 %v2845_v4, %v2845_v4 }
 0x10a   :  { %v312_v6 = vsel %vm101_vm0, %v294_v5, 0.0  ;;  %v383_v5 = vmul.f32 %v2778_v32, %v2778_v32 }
 0x10b   :  { %339 = vadd.xlane.f32.xlu2 %v312_v6 }
 0x10d   :  { %v273_v7 = vpop.f32.mrf.mxu0 }
 0x10e   :  { %v2852_v8 = vadd.f32 %v2751_v18, %v273_v7 }
 0x110   :  { %v295_v9 = vmul.f32 %v2852_v8, %v2852_v8 }
 0x112   :  { %v313_v10 = vsel %vm101_vm0, %v295_v9, 0.0 }
 0x113   :  { %341 = vadd.xlane.f32.xlu0 %v313_v10 }
 0x115   :  { %v275_v11 = vpop.f32.mrf.mxu0 }
 0x116   :  { %v2859_v12 = vadd.f32 %v2751_v18, %v275_v11 }
 0x118   :  { %v296_v13 = vmul.f32 %v2859_v12, %v2859_v12 }
 0x11a   :  { %v314_v14 = vsel %vm101_vm0, %v296_v13, 0.0 }
 0x11b   :  { %343 = vadd.xlane.f32.xlu2 %v314_v14 }
 0x11c   :  { %456 = vperm.xlu1 %2442, %v354_v15  }
 0x124   :  { %v2870_v56 = vpop.permute.xlu1 %431 }
 0x126   :  { %v318_v16 = vpop.xlane.xlu0 %317 }
 0x127   :  { %v365_v20 = vmul.f32 0.01, %v318_v16 }
 0x129   :  { %v397_v23 = vsub.f32 %v365_v20, %v381_v17 }
 0x12b   :  { %v413_v25 = vmax.f32 %v397_v23, 0.0  ;;  %v384_v23 = vmul.f32 %v352_v57, %v352_v57 }
 0x12d   :  { %v525_v27 = vadd.f32 1e-05, %v413_v25 }
 0x12e   :  { %v320_v28 = vpop.xlane.xlu0 %319 }
 0x12f   :  { %2456 = vrsqrt.f32 %v525_v27  ;;  %v366_v30 = vmul.f32 0.01, %v320_v28  ;;  %vm547_vm2 = vweird.f32 %v525_v27  ;;  %v2879_v28 = vmul.f32 0.01, %v2810_v49 }
 0x131   :  { %v398_v33 = vsub.f32 %v366_v30, %v382_v29 }
 0x133   :  { %v414_v35 = vmax.f32 %v398_v33, 0.0  ;;  %436 = vperm.xlu2 %2444, %v350_v24  }
 0x135   :  { %v2457_v36 = vpop.eup %2456  ;;  %v526_v37 = vadd.f32 1e-05, %v414_v35 }
 0x136   :  { %v542_v39 = vmul.f32 %v2457_v36, %v525_v27  ;;  %vm548_vm1 = vweird.f32 %v2457_v36 }
 0x137   :  { %2458 = vrsqrt.f32 %v526_v37  ;;  %vm549_vm3 = vmor %vm547_vm2, %vm548_vm1  ;;  %vm557_vm5 = vweird.f32 %v526_v37 }
 0x138   :  { %v543_v40 = vmul.f32 %v2457_v36, %v542_v39 }
 0x13a   :  { %v544_v41 = vmul.f32 0.5, %v543_v40 }
 0x13b   :  { %451 = vperm.xlu2 %2444, %v353_v22   ;;  %v388_v22 = vmul.f32 %v2879_v28, %v2879_v28 }
 0x13c   :  { %v545_v43 = vsub.f32 1.5, %v544_v41 }
 0x13d   :  { %v2459_v44 = vpop.eup %2458 }
 0x13e   :  { %v552_v45 = vmul.f32 %v2459_v44, %v526_v37  ;;  %v546_v46 = vmul.f32 %v2457_v36, %v545_v43  ;;  %vm558_vm4 = vweird.f32 %v2459_v44 }
 0x13f   :  { %vm559_vm6 = vmor %vm557_vm5, %vm558_vm4 }
 0x140   :  { %v550_v47 = vsel %vm549_vm3, %v2457_v36, %v546_v46  ;;  %v553_v48 = vmul.f32 %v2459_v44, %v552_v45 }
 0x141   :  { %703 = vperm.xlu0 %2443, %v550_v47  }
 0x142   :  { %v554_v50 = vmul.f32 0.5, %v553_v48 }
 0x144   :  { %v555_v51 = vsub.f32 1.5, %v554_v50 }
 0x146   :  { %v326_v52 = vpop.xlane.xlu2 %325  ;;  %v556_v55 = vmul.f32 %v2459_v44, %v555_v51 }
 0x147   :  { %v369_v60 = vmul.f32 0.01, %v326_v52 }
 0x148   :  { %v560_v58 = vsel %vm559_vm6, %v2459_v44, %v556_v55  ;;  %v2885_v44 = vpop.permute.xlu0 %441  ;;  %v2890_v55 = vmul.f32 0.01, %v2817_v53 }
 0x149   :  { %446 = vperm.xlu0 %2443, %v352_v57   ;;  %708 = vperm.xlu2 %2444, %v560_v58   ;;  %v401_v0 = vsub.f32 %v369_v60, %v385_v61  ;;  %v355_v60 = vmul.f32 0.01, %v2820_v54 }
 0x14b   :  { %v417_v10 = vmax.f32 %v401_v0, 0.0 }
 0x14d   :  { %v2875_v17 = vadd.f32 1e-05, %v417_v10 }
 0x14e   :  { %v328_v62 = vpop.xlane.xlu2 %327 }
 0x14f   :  { %v370_v2 = vmul.f32 0.01, %v328_v62  ;;  %v322_v3 = vpop.xlane.xlu1 %321  ;;  %vm587_vm2 = vweird.f32 %v2875_v17 }
 0x150   :  { %v367_v6 = vmul.f32 0.01, %v322_v3 }
 0x151   :  { %v402_v7 = vsub.f32 %v370_v2, %v386_v1 }
 0x152   :  { %v399_v9 = vsub.f32 %v367_v6, %v383_v5  ;;  %v389_v5 = vmul.f32 %v2890_v55, %v2890_v55 }
 0x153   :  { %v418_v11 = vmax.f32 %v402_v7, 0.0 }
 0x154   :  { %v415_v13 = vmax.f32 %v399_v9, 0.0  ;;  %v387_v9 = vmul.f32 %v355_v60, %v355_v60 }
 0x155   :  { %v530_v14 = vadd.f32 1e-05, %v418_v11 }
 0x156   :  { %v527_v16 = vadd.f32 1e-05, %v415_v13 }
 0x157   :  { %2460 = vrsqrt.f32 %v530_v14  ;;  %v324_v20 = vpop.xlane.xlu1 %323  ;;  %vm597_vm9 = vweird.f32 %v530_v14 }
 0x158   :  { %2462 = vrsqrt.f32 %v527_v16  ;;  %v368_v15 = vmul.f32 0.01, %v324_v20  ;;  %vm567_vm11 = vweird.f32 %v527_v16 }
 0x159   :  { %2464 = vrsqrt.f32 %v2875_v17 }
 0x15a   :  { %v400_v24 = vsub.f32 %v368_v15, %v384_v23  ;;  %v2899_v15 = vmul.f32 0.01, %v2829_v59 }
 0x15c   :  { %v416_v25 = vmax.f32 %v400_v24, 0.0 }
 0x15d   :  { %v2461_v32 = vpop.eup %2460 }
 0x15e   :  { %v2463_v27 = vpop.eup %2462  ;;  %v592_v29 = vmul.f32 %v2461_v32, %v530_v14  ;;  %v528_v30 = vadd.f32 1e-05, %v416_v25  ;;  %vm598_vm7 = vweird.f32 %v2461_v32 }
 0x15f   :  { %v562_v33 = vmul.f32 %v2463_v27, %v527_v16  ;;  %v332_v35 = vpop.xlane.xlu1 %331  ;;  %v2881_v39 = vpop.eup %2464  ;;  %vm568_vm8 = vweird.f32 %v2463_v27  ;;  %vm599_vm10 = vmor %vm597_vm9, %vm598_vm7 }
 0x160   :  { %2466 = vrsqrt.f32 %v528_v30  ;;  %v372_v36 = vmul.f32 0.01, %v332_v35  ;;  %v593_v37 = vmul.f32 %v2461_v32, %v592_v29  ;;  %v582_v45 = vmul.f32 %v2881_v39, %v2875_v17  ;;  %vm569_vm12 = vmor %vm567_vm11, %vm568_vm8 }
 0x161   :  { %v563_v40 = vmul.f32 %v2463_v27, %v562_v33  ;;  %vm577_vm14 = vweird.f32 %v528_v30  ;;  %v390_v33 = vmul.f32 %v2899_v15, %v2899_v15  ;;  %vm588_vm1 = vweird.f32 %v2881_v39 }
 0x162   :  { %v594_v41 = vmul.f32 0.5, %v593_v37  ;;  %v404_v46 = vsub.f32 %v372_v36, %v388_v22  ;;  %v583_v0 = vmul.f32 %v2881_v39, %v582_v45  ;;  %vm589_vm3 = vmor %vm587_vm2, %vm588_vm1 }
 0x163   :  { %v564_v43 = vmul.f32 0.5, %v563_v40 }
 0x164   :  { %v595_v47 = vsub.f32 1.5, %v594_v41  ;;  %v420_v61 = vmax.f32 %v404_v46, 0.0  ;;  %v584_v11 = vmul.f32 0.5, %v583_v0  ;;  %v2916_v46 = vpop.f32.mrf.mxu0 }
 0x165   :  { %v565_v48 = vsub.f32 1.5, %v564_v43 }
 0x166   :  { %v2467_v50 = vpop.eup %2466  ;;  %v334_v51 = vpop.xlane.xlu2 %333  ;;  %v596_v52 = vmul.f32 %v2461_v32, %v595_v47  ;;  %v2896_v7 = vadd.f32 1e-05, %v420_v61  ;;  %v585_v24 = vsub.f32 1.5, %v584_v11  ;;  %v2425_v61 = vld [vmem:[#allocation5 + $0x30] sm:$0xff] }
 0x167   :  { %v572_v57 = vmul.f32 %v2467_v50, %v528_v30  ;;  %v566_v58 = vmul.f32 %v2463_v27, %v565_v48  ;;  %v373_v1 = vmul.f32 0.01, %v334_v51  ;;  %vm578_vm13 = vweird.f32 %v2467_v50 }
 0x168   :  { %v600_v62 = vsel %vm599_vm10, %v2461_v32, %v596_v52  ;;  %vm579_vm15 = vmor %vm577_vm14, %vm578_vm13  ;;  %2468 = vrsqrt.f32 %v2896_v7  ;;  %v586_v37 = vmul.f32 %v2881_v39, %v585_v24  ;;  %vm617_vm8 = vweird.f32 %v2896_v7 }
 0x169   :  { %728 = vperm.xlu2 %2444, %v600_v62   ;;  %v570_v2 = vsel %vm569_vm12, %v2463_v27, %v566_v58  ;;  %v573_v3 = vmul.f32 %v2467_v50, %v572_v57  ;;  %v405_v13 = vsub.f32 %v373_v1, %v389_v5  ;;  %v2426_v57 = vld [vmem:[#allocation5 + $0x38] sm:$0xff] }
 0x16a   :  { %713 = vperm.xlu0 %2443, %v570_v2   ;;  %v590_v43 = vsel %vm589_vm3, %v2881_v39, %v586_v37  ;;  %v2924_v39 = vmul.f32 0.01, %v2845_v4  ;;  %929 = vmatpush.bf16.msra.mxu1 %v2426_v57 }
 0x16b   :  { %v574_v6 = vmul.f32 0.5, %v573_v3  ;;  %v421_v25 = vmax.f32 %v405_v13, 0.0 }
 0x16c   :  { %v330_v10 = vpop.xlane.xlu0 %329  ;;  %v392_v5 = vmul.f32 %v2924_v39, %v2924_v39 }
 0x16d   :  { %v371_v14 = vmul.f32 0.01, %v330_v10  ;;  %v575_v16 = vsub.f32 1.5, %v574_v6  ;;  %v2905_v30 = vadd.f32 1e-05, %v421_v25  ;;  %v280_v10 = vpop.f32.mrf.mxu0 }
 0x16e   :  { %v2908_v40 = vpop.eup %2468  ;;  %930 = vmatpush.bf16.msra.mxu1 %v2425_v61  ;;  %v2940_v25 = vadd.f32 %v2751_v18, %v280_v10  ;;  %v2970_v10 = vadd.f32 %v2751_v18, %v2916_v46 }
 0x16f   :  { %v403_v20 = vsub.f32 %v371_v14, %v387_v9  ;;  %v576_v23 = vmul.f32 %v2467_v50, %v575_v16  ;;  %v612_v45 = vmul.f32 %v2908_v40, %v2896_v7  ;;  %vm618_vm7 = vweird.f32 %v2908_v40 }
 0x170   :  { %v298_v37 = vmul.f32 %v2940_v25, %v2940_v25  ;;  %vm619_vm9 = vmor %vm617_vm8, %vm618_vm7  ;;  %vm627_vm11 = vweird.f32 %v2905_v30  ;;  %v297_v18 = vmul.f32 %v2970_v10, %v2970_v10 }
 0x171   :  { %v419_v32 = vmax.f32 %v403_v20, 0.0  ;;  %v580_v27 = vsel %vm579_vm15, %v2467_v50, %v576_v23  ;;  %v613_v52 = vmul.f32 %v2908_v40, %v612_v45  ;;  %v2424_v23 = vld [vmem:[#allocation5 + $0x28] sm:$0xff] }
 0x172   :  { %718 = vperm.xlu1 %2442, %v580_v27   ;;  %461 = vperm.xlu0 %2443, %v355_v60   ;;  %v316_v57 = vsel %vm101_vm0, %v298_v37, 0.0 }
 0x173   :  { %v531_v29 = vadd.f32 1e-05, %v419_v32  ;;  %v614_v3 = vmul.f32 0.5, %v613_v52  ;;  %931 = vmatpush.bf16.msra.mxu1 %v2424_v23  ;;  %v2954_v52 = vmul.f32 0.01, %v2852_v8 }
 0x174   :  { %v336_v35 = vpop.xlane.xlu0 %335 }
 0x175   :  { %2470 = vrsqrt.f32 %v531_v29  ;;  %v374_v36 = vmul.f32 0.01, %v336_v35  ;;  %vm607_vm5 = vweird.f32 %v531_v29  ;;  %v615_v16 = vsub.f32 1.5, %v614_v3 }
 0x176   :  { %2472 = vrsqrt.f32 %v2905_v30  ;;  %v338_v62 = vpop.xlane.xlu1 %337 }
 0x177   :  { %v406_v22 = vsub.f32 %v374_v36, %v390_v33  ;;  %v375_v6 = vmul.f32 0.01, %v338_v62  ;;  %v616_v33 = vmul.f32 %v2908_v40, %v615_v16  ;;  %v2423_v36 = vld [vmem:[#allocation5 + $0x20] sm:$0xff]  ;;  %v2421_v62 = vld [vmem:[#allocation5 + $0x10] sm:$0xff] }
 0x178   :  { %932 = vmatpush.bf16.msra.mxu1 %v2423_v36  ;;  %v2419_v16 = vld [vmem:[#allocation5] sm:$0xff] }
 0x179   :  { %v422_v41 = vmax.f32 %v406_v22, 0.0 }
 0x17a   :  { %723 = vperm.xlu1 %2442, %v590_v43   ;;  %466 = vperm.xlu0 %2443, %v2879_v28   ;;  %v2927_v28 = vmul.f32 0.01, %v2836_v63 }
 0x17b   :  { %v2471_v47 = vpop.eup %2470  ;;  %v2918_v50 = vadd.f32 1e-05, %v422_v41  ;;  %v2422_v41 = vld [vmem:[#allocation5 + $0x18] sm:$0xff] }
 0x17c   :  { %v602_v48 = vmul.f32 %v2471_v47, %v531_v29  ;;  %v2921_v58 = vpop.eup %2472  ;;  %vm608_vm4 = vweird.f32 %v2471_v47  ;;  %v391_v13 = vmul.f32 %v2927_v28, %v2927_v28  ;;  %933 = vmatpush.bf16.msra.mxu1 %v2422_v41 }
 0x17d   :  { %2474 = vrsqrt.f32 %v2918_v50  ;;  %v622_v1 = vmul.f32 %v2921_v58, %v2905_v30  ;;  %vm609_vm6 = vmor %vm607_vm5, %vm608_vm4  ;;  %vm628_vm10 = vweird.f32 %v2921_v58  ;;  %vm637_vm14 = vweird.f32 %v2918_v50 }
 0x17e   :  { %v340_v51 = vpop.xlane.xlu2 %339  ;;  %v603_v17 = vmul.f32 %v2471_v47, %v602_v48  ;;  %v407_v32 = vsub.f32 %v375_v6, %v391_v13  ;;  %v620_v48 = vsel %vm619_vm9, %v2908_v40, %v616_v33  ;;  %vm629_vm12 = vmor %vm627_vm11, %vm628_vm10  ;;  %v362_v33 = vmul.f32 0.01, %v2859_v12 }
 0x17f   :  { %v376_v0 = vmul.f32 0.01, %v340_v51  ;;  %v623_v20 = vmul.f32 %v2921_v58, %v622_v1 }
 0x180   :  { %v604_v60 = vmul.f32 0.5, %v603_v17  ;;  %v423_v22 = vmax.f32 %v407_v32, 0.0  ;;  %934 = vmatpush.bf16.msra.mxu1 %v2421_v62 }
 0x181   :  { %v408_v11 = vsub.f32 %v376_v0, %v392_v5  ;;  %v624_v35 = vmul.f32 0.5, %v623_v20  ;;  %v393_v0 = vmul.f32 %v2954_v52, %v2954_v52  ;;  %v2420_v5 = vld [vmem:[#allocation5 + $0x8] sm:$0xff] }
 0x182   :  { %v605_v2 = vsub.f32 1.5, %v604_v60  ;;  %v2958_v7 = vadd.f32 1e-05, %v423_v22 }
 0x183   :  { %v2937_v24 = vpop.eup %2474  ;;  %v424_v27 = vmax.f32 %v408_v11, 0.0  ;;  %v625_v51 = vsub.f32 1.5, %v624_v35 }
 0x184   :  { %v606_v9 = vmul.f32 %v2471_v47, %v605_v2  ;;  %v632_v29 = vmul.f32 %v2937_v24, %v2918_v50  ;;  %935 = vmatpush.bf16.msra.mxu1 %v2420_v5  ;;  %vm638_vm13 = vweird.f32 %v2937_v24  ;;  %v315_v50 = vsel %vm101_vm0, %v297_v18, 0.0 }
 0x185   :  { %v2949_v43 = vadd.f32 1e-05, %v424_v27  ;;  %v626_v61 = vmul.f32 %v2921_v58, %v625_v51  ;;  %vm639_vm15 = vmor %vm637_vm14, %vm638_vm13  ;;  %vm647_vm5 = vweird.f32 %v2958_v7 }
 0x186   :  { %v610_v14 = vsel %vm609_vm6, %v2471_v47, %v606_v9  ;;  %v342_v45 = vpop.xlane.xlu0 %341  ;;  %v633_v17 = vmul.f32 %v2937_v24, %v632_v29 }
 0x187   :  { %733 = vperm.xlu0 %2443, %v610_v14   ;;  %2476 = vrsqrt.f32 %v2949_v43  ;;  %v377_v60 = vmul.f32 0.01, %v342_v45  ;;  %v630_v2 = vsel %vm629_vm12, %v2921_v58, %v626_v61  ;;  %vm657_vm2 = vweird.f32 %v2949_v43 }
 0x188   :  { %v634_v40 = vmul.f32 0.5, %v633_v17  ;;  %2478 = vrsqrt.f32 %v2958_v7  ;;  %936 = vmatpush.bf16.msra.mxu1 %v2419_v16 }
 0x189   :  { %v409_v1 = vsub.f32 %v377_v60, %v393_v0  ;;  %v3005_v0 = vld [vmem:[%s3683_s4] ss:$0 sm:$0xff] }
 0x18a   :  { %v635_v3 = vsub.f32 1.5, %v634_v40 }
 0x18b   :  { %v425_v11 = vmax.f32 %v409_v1, 0.0 }
 0x18c   :  { %v636_v30 = vmul.f32 %v2937_v24, %v635_v3 }
 0x18d   :  { %v2477_v6 = vpop.eup %2476  ;;  %v2977_v20 = vadd.f32 1e-05, %v425_v11 }
 0x18e   :  { %v344_v47 = vpop.xlane.xlu2 %343  ;;  %v2479_v13 = vpop.eup %2478  ;;  %v652_v14 = vmul.f32 %v2477_v6, %v2949_v43  ;;  %v640_v46 = vsel %vm639_vm15, %v2937_v24, %v636_v30  ;;  %v394_v24 = vmul.f32 %v362_v33, %v362_v33  ;;  %vm658_vm1 = vweird.f32 %v2477_v6 }
 0x18f   :  { %738 = vperm.xlu0 %2443, %v620_v48   ;;  %v642_v58 = vmul.f32 %v2479_v13, %v2958_v7  ;;  %2480 = vrsqrt.f32 %v2977_v20  ;;  %v378_v22 = vmul.f32 0.01, %v344_v47  ;;  %vm659_vm3 = vmor %vm657_vm2, %vm658_vm1  ;;  %vm648_vm4 = vweird.f32 %v2479_v13 }
 0x190   :  { %v653_v23 = vmul.f32 %v2477_v6, %v652_v14  ;;  %vm649_vm6 = vmor %vm647_vm5, %vm648_vm4  ;;  %vm667_vm8 = vweird.f32 %v2977_v20 }
 0x191   :  { %v643_v27 = vmul.f32 %v2479_v13, %v642_v58  ;;  %v410_v51 = vsub.f32 %v378_v22, %v394_v24 }
 0x192   :  { %347 = vadd.xlane.f32.xlu2 %v316_v57  ;;  %v654_v29 = vmul.f32 0.5, %v653_v23 }
 0x193   :  { %v644_v35 = vmul.f32 0.5, %v643_v27 }
 0x194   :  { %v655_v36 = vsub.f32 1.5, %v654_v29 }
 0x195   :  { %v2481_v37 = vpop.eup %2480  ;;  %v645_v41 = vsub.f32 1.5, %v644_v35 }
 0x196   :  { %v437_v9 = vpop.permute.xlu2 %436  ;;  %v662_v45 = vmul.f32 %v2481_v37, %v2977_v20  ;;  %v656_v48 = vmul.f32 %v2477_v6, %v655_v36  ;;  %vm668_vm7 = vweird.f32 %v2481_v37  ;;  %v511_v36 = vsub.f32 %v2775_v31, %v2885_v44 }
 0x197   :  { %743 = vperm.xlu0 %2443, %v630_v2   ;;  %v510_v57 = vsub.f32 %v2768_v26, %v437_v9  ;;  %v646_v60 = vmul.f32 %v2479_v13, %v645_v41  ;;  %v509_v26 = vsub.f32 %v2756_v21, %v2870_v56  ;;  %vm669_vm9 = vmor %vm667_vm8, %vm668_vm7 }
 0x198   :  { %v660_v61 = vsel %vm659_vm3, %v2477_v6, %v656_v48  ;;  %v663_v40 = vmul.f32 %v2481_v37, %v662_v45  ;;  %v3008_v6 = vmul.f32 0.01, %v2940_v25 }
 0x199   :  { %v650_v62 = vsel %vm649_vm6, %v2479_v13, %v646_v60 }
 0x19a   :  { %v664_v1 = vmul.f32 0.5, %v663_v40 }
 0x19c   :  { %v665_v21 = vsub.f32 1.5, %v664_v1 }
 0x19e   :  { %v2983_v32 = vpop.permute.xlu2 %451  ;;  %v666_v14 = vmul.f32 %v2481_v37, %v665_v21 }
 0x19f   :  { %748 = vperm.xlu0 %2443, %v640_v46   ;;  %v3017_v46 = vmul.f32 0.01, %v2970_v10 }
 0x1a0   :  { %v670_v58 = vsel %vm669_vm9, %v2481_v37, %v666_v14  ;;  %v396_v14 = vmul.f32 %v3008_v6, %v3008_v6 }
 0x1a4   :  { %345 = vadd.xlane.f32.xlu1 %v315_v50 }
 0x1a6   :  { %v709_v17 = vpop.permute.xlu2 %708 }
 0x1a7   :  { %481 = vperm.xlu0 %2443, %v2927_v28   ;;  %v2996_v28 = vld [vmem:[%s3682_s3] ss:$0 sm:$0xff]  ;;  %v782_v47 = vmul.f32 %v709_v17, %v510_v57  ;;  %v513_v17 = vsub.f32 %v2781_v34, %v2983_v32 }
 0x1a9   :  { %v802_v43 = vmul.f32 %v2996_v28, %v782_v47 }
 0x1aa   :  { %476 = vperm.xlu2 %2444, %v2899_v15   ;;  %v426_v15 = vmax.f32 %v410_v51, 0.0 }
 0x1ab   :  { %v822_v9 = vadd.f32 %v3005_v0, %v802_v43 }
 0x1ac   :  { %v538_v2 = vadd.f32 1e-05, %v426_v15 }
 0x1ad   :  { %v838_v13 = vmax.f32 %v822_v9, 0.0 }
 0x1ae   :  { %2482 = vrsqrt.f32 %v538_v2  ;;  %vm677_vm11 = vweird.f32 %v538_v2 }
 0x1af   :  { %758 = vperm.xlu0 %2443, %v660_v61  }
 0x1b2   :  { %753 = vperm.xlu2 %2444, %v650_v62  }
 0x1b3   :  { %v704_v3 = vpop.permute.xlu0 %703 }
 0x1b4   :  { %v781_v5 = vmul.f32 %v704_v3, %v509_v26  ;;  %v2483_v16 = vpop.eup %2482 }
 0x1b5   :  { %v672_v18 = vmul.f32 %v2483_v16, %v538_v2  ;;  %vm678_vm10 = vweird.f32 %v2483_v16 }
 0x1b6   :  { %v801_v7 = vmul.f32 %v2996_v28, %v781_v5  ;;  %vm679_vm12 = vmor %vm677_vm11, %vm678_vm10 }
 0x1b7   :  { %506 = vperm.xlu0 %2443, %v3008_v6   ;;  %v673_v23 = vmul.f32 %v2483_v16, %v672_v18  ;;  %v395_v6 = vmul.f32 %v3017_v46, %v3017_v46 }
 0x1b8   :  { %v821_v56 = vadd.f32 %v3005_v0, %v801_v7 }
 0x1b9   :  { %v674_v50 = vmul.f32 0.5, %v673_v23 }
 0x1ba   :  { %496 = vperm.xlu2 %2444, %v362_v33   ;;  %v837_v11 = vmax.f32 %v821_v56, 0.0  ;;  %v457_v33 = vpop.permute.xlu1 %456 }
 0x1bb   :  { %v675_v27 = vsub.f32 1.5, %v674_v50 }
 0x1bc   :  { %v853_v30 = vpack.c.bf16 %v838_v13, %v837_v11 }
 0x1bd   :  { %471 = vperm.xlu1 %2442, %v2890_v55   ;;  %v676_v20 = vmul.f32 %v2483_v16, %v675_v27  ;;  %v447_v55 = vpop.permute.xlu0 %446 }
 0x1be   :  { %937 = vmatmul.bf16.vlgmr.msra.gmra.mxu1 %v853_v30  ;;  %v512_v22 = vsub.f32 %v2798_v42, %v447_v55  ;;  %v514_v42 = vsub.f32 %v2789_v38, %v457_v33 }
 0x1bf   :  { %763 = vperm.xlu0 %2443, %v670_v58   ;;  %v680_v29 = vsel %vm679_vm12, %v2483_v16, %v676_v20 }
 0x1c2   :  { %501 = vperm.xlu2 %2444, %v3017_v46  }
 0x1c3   :  { %v729_v31 = vpop.permute.xlu2 %728 }
 0x1c4   :  { %v786_v40 = vmul.f32 %v729_v31, %v514_v42 }
 0x1c5   :  { %486 = vperm.xlu1 %2442, %v2924_v39  }
 0x1c6   :  { %v806_v26 = vmul.f32 %v2996_v28, %v786_v40 }
 0x1c8   :  { %v826_v1 = vadd.f32 %v3005_v0, %v806_v26 }
 0x1ca   :  { %v842_v2 = vmax.f32 %v826_v1, 0.0 }
 0x1cd   :  { %491 = vperm.xlu1 %2442, %v2954_v52  }
 0x1d5   :  { %768 = vperm.xlu1 %2442, %v680_v29  }
 0x1dc   :  { %v714_v35 = vpop.permute.xlu0 %713 }
 0x1dd   :  { %v783_v37 = vmul.f32 %v714_v35, %v511_v36 }
 0x1df   :  { %v803_v39 = vmul.f32 %v2996_v28, %v783_v37 }
 0x1e1   :  { %v823_v48 = vadd.f32 %v3005_v0, %v803_v39 }
 0x1e3   :  { %v839_v57 = vmax.f32 %v823_v48, 0.0 }
 0x1e4   :  { %v719_v24 = vpop.permute.xlu1 %718  ;;  %v462_v45 = vpop.permute.xlu0 %461 }
 0x1e5   :  { %v784_v41 = vmul.f32 %v719_v24, %v512_v22  ;;  %v515_v3 = vsub.f32 %v2820_v54, %v462_v45 }
 0x1e7   :  { %v804_v52 = vmul.f32 %v2996_v28, %v784_v41 }
 0x1e9   :  { %v824_v51 = vadd.f32 %v3005_v0, %v804_v52 }
 0x1eb   :  { %v840_v60 = vmax.f32 %v824_v51, 0.0 }
 0x1ec   :  { %v724_v44 = vpop.permute.xlu1 %723  ;;  %v467_v62 = vpop.permute.xlu0 %466 }
 0x1ed   :  { %v785_v47 = vmul.f32 %v724_v44, %v513_v17  ;;  %v854_v61 = vpack.c.bf16 %v840_v60, %v839_v57  ;;  %v516_v7 = vsub.f32 %v2810_v49, %v467_v62 }
 0x1ef   :  { %942 = vmatmul.bf16.gmra.mxu1 %v854_v61  ;;  %v805_v15 = vmul.f32 %v2996_v28, %v785_v47 }
 0x1f1   :  { %v825_v43 = vadd.f32 %v3005_v0, %v805_v15 }
 0x1f3   :  { %v841_v32 = vmax.f32 %v825_v43, 0.0 }
 0x1f5   :  { %v855_v5 = vpack.c.bf16 %v842_v2, %v841_v32 }
 0x1f9   :  { %v734_v34 = vpop.permute.xlu0 %733 }
 0x1fa   :  { %v787_v38 = vmul.f32 %v734_v34, %v515_v3 }
 0x1fc   :  { %v807_v56 = vmul.f32 %v2996_v28, %v787_v38 }
 0x1fe   :  { %v827_v54 = vadd.f32 %v3005_v0, %v807_v56 }
 0x1ff   :  { %947 = vmatmul.bf16.gmra.mxu1 %v855_v5 }
 0x200   :  { %v843_v50 = vmax.f32 %v827_v54, 0.0 }
 0x201   :  { %v739_v9 = vpop.permute.xlu0 %738 }
 0x202   :  { %v788_v21 = vmul.f32 %v739_v9, %v516_v7 }
 0x204   :  { %v808_v11 = vmul.f32 %v2996_v28, %v788_v21 }
 0x205   :  { %v348_v13 = vpop.xlane.xlu2 %347 }
 0x206   :  { %v380_v30 = vmul.f32 0.01, %v348_v13  ;;  %v828_v16 = vadd.f32 %v3005_v0, %v808_v11 }
 0x208   :  { %v412_v58 = vsub.f32 %v380_v30, %v396_v14  ;;  %v844_v18 = vmax.f32 %v828_v16, 0.0 }
 0x209   :  { %v744_v36 = vpop.permute.xlu0 %743 }
 0x20a   :  { %v428_v23 = vmax.f32 %v412_v58, 0.0  ;;  %v856_v27 = vpack.c.bf16 %v844_v18, %v843_v50 }
 0x20c   :  { %v540_v49 = vadd.f32 1e-05, %v428_v23 }
 0x20d   :  { %v477_v17 = vpop.permute.xlu2 %476 }
 0x20e   :  { %2484 = vrsqrt.f32 %v540_v49  ;;  %vm697_vm14 = vweird.f32 %v540_v49  ;;  %v518_v46 = vsub.f32 %v2829_v59, %v477_v17 }
 0x20f   :  { %952 = vmatmul.bf16.gmra.mxu1 %v856_v27 }
 0x211   :  { %v749_v48 = vpop.permute.xlu0 %748 }
 0x212   :  { %v790_v44 = vmul.f32 %v749_v48, %v518_v46 }
 0x214   :  { %v2485_v20 = vpop.eup %2484  ;;  %v810_v15 = vmul.f32 %v2996_v28, %v790_v44 }
 0x215   :  { %v692_v55 = vmul.f32 %v2485_v20, %v540_v49  ;;  %vm698_vm13 = vweird.f32 %v2485_v20  ;;  %v754_v56 = vpop.permute.xlu2 %753 }
 0x216   :  { %vm699_vm15 = vmor %vm697_vm14, %vm698_vm13  ;;  %v830_v59 = vadd.f32 %v3005_v0, %v810_v15 }
 0x217   :  { %v346_v29 = vpop.xlane.xlu1 %345  ;;  %v693_v33 = vmul.f32 %v2485_v20, %v692_v55 }
 0x218   :  { %v379_v35 = vmul.f32 0.01, %v346_v29  ;;  %v846_v7 = vmax.f32 %v830_v59, 0.0 }
 0x219   :  { %v694_v37 = vmul.f32 0.5, %v693_v33  ;;  %v482_v42 = vpop.permute.xlu0 %481 }
 0x21a   :  { %v411_v22 = vsub.f32 %v379_v35, %v395_v6  ;;  %v519_v3 = vsub.f32 %v2836_v63, %v482_v42 }
 0x21b   :  { %v695_v39 = vsub.f32 1.5, %v694_v37 }
 0x21c   :  { %v427_v24 = vmax.f32 %v411_v22, 0.0  ;;  %v791_v13 = vmul.f32 %v754_v56, %v519_v3 }
 0x21d   :  { %v696_v41 = vmul.f32 %v2485_v20, %v695_v39 }
 0x21e   :  { %v539_v52 = vadd.f32 1e-05, %v427_v24  ;;  %v811_v54 = vmul.f32 %v2996_v28, %v791_v13 }
 0x21f   :  { %v700_v45 = vsel %vm699_vm15, %v2485_v20, %v696_v41  ;;  %v497_v20 = vpop.permute.xlu2 %496 }
 0x220   :  { %2486 = vrsqrt.f32 %v539_v52  ;;  %778 = vperm.xlu2 %2444, %v700_v45   ;;  %vm687_vm2 = vweird.f32 %v539_v52  ;;  %v831_v27 = vadd.f32 %v3005_v0, %v811_v54  ;;  %v522_v6 = vsub.f32 %v2859_v12, %v497_v20 }
 0x221   :  { %v759_v32 = vpop.permute.xlu0 %758 }
 0x226   :  { %v2487_v51 = vpop.eup %2486 }
 0x227   :  { %v682_v57 = vmul.f32 %v2487_v51, %v539_v52  ;;  %vm688_vm1 = vweird.f32 %v2487_v51  ;;  %v502_v3 = vpop.permute.xlu2 %501 }
 0x228   :  { %vm689_vm3 = vmor %vm687_vm2, %vm688_vm1 }
 0x229   :  { %v683_v60 = vmul.f32 %v2487_v51, %v682_v57  ;;  %v507_v18 = vpop.permute.xlu0 %506 }
 0x22b   :  { %v684_v31 = vmul.f32 0.5, %v683_v60 }
 0x22d   :  { %v685_v47 = vsub.f32 1.5, %v684_v31 }
 0x22f   :  { %v472_v61 = vpop.permute.xlu1 %471  ;;  %v686_v40 = vmul.f32 %v2487_v51, %v685_v47 }
 0x230   :  { %v517_v62 = vsub.f32 %v2817_v53, %v472_v61  ;;  %v3057_v53 = vld [vmem:[%s3685_s6] ss:$0 sm:$0xff] }
 0x231   :  { %v690_v26 = vsel %vm689_vm3, %v2487_v51, %v686_v40  ;;  %v764_v39 = vpop.permute.xlu0 %763 }
 0x232   :  { %v789_v43 = vmul.f32 %v744_v36, %v517_v62  ;;  %773 = vperm.xlu1 %2442, %v690_v26   ;;  %v847_v36 = vmax.f32 %v831_v27, 0.0 }
 0x234   :  { %v809_v1 = vmul.f32 %v2996_v28, %v789_v43 }
 0x236   :  { %v829_v34 = vadd.f32 %v3005_v0, %v809_v1 }
 0x237   :  { %v487_v2 = vpop.permute.xlu1 %486 }
 0x238   :  { %v520_v5 = vsub.f32 %v2845_v4, %v487_v2  ;;  %v845_v38 = vmax.f32 %v829_v34, 0.0 }
 0x23a   :  { %v792_v9 = vmul.f32 %v759_v32, %v520_v5  ;;  %v857_v21 = vpack.c.bf16 %v846_v7, %v845_v38  ;;  %v524_v38 = vsub.f32 %v2940_v25, %v507_v18 }
 0x23b   :  { %v938_v11 = vpop.f32.mrf.mxu1 }
 0x23c   :  { %v3060_v14 = vadd.f32 %v3057_v53, %v938_v11  ;;  %957 = vmatmul.bf16.gmra.mxu1 %v857_v21  ;;  %v812_v63 = vmul.f32 %v2996_v28, %v792_v9  ;;  %v523_v21 = vsub.f32 %v2970_v10, %v502_v3 }
 0x23e   :  { %v3064_v4 = vmul.f32 0.01, %v3060_v14  ;;  %v978_v30 = vmul.f32 %v3060_v14, %v3060_v14  ;;  %v832_v23 = vadd.f32 %v3005_v0, %v812_v63 }
 0x23f   :  { %v492_v16 = vpop.permute.xlu1 %491 }
 0x240   :  { %1124 = vperm.xlu1 %2442, %v3064_v4   ;;  %v994_v58 = vsel %vm101_vm0, %v978_v30, 0.0  ;;  %v848_v29 = vmax.f32 %v832_v23, 0.0  ;;  %v521_v35 = vsub.f32 %v2852_v8, %v492_v16 }
 0x241   :  { %1010 = vadd.xlane.f32.xlu0 %v994_v58 }
 0x242   :  { %v858_v22 = vpack.c.bf16 %v848_v29, %v847_v36  ;;  %v793_v24 = vmul.f32 %v764_v39, %v521_v35 }
 0x243   :  { %v940_v50 = vpop.f32.mrf.mxu1 }
 0x244   :  { %v3074_v49 = vadd.f32 %v3057_v53, %v940_v50  ;;  %v813_v52 = vmul.f32 %v2996_v28, %v793_v24 }
 0x246   :  { %v3078_v55 = vmul.f32 0.01, %v3074_v49  ;;  %v833_v48 = vadd.f32 %v3005_v0, %v813_v52  ;;  %v979_v8 = vmul.f32 %v3074_v49, %v3074_v49 }
 0x247   :  { %v769_v33 = vpop.permute.xlu1 %768 }
 0x248   :  { %1129 = vperm.xlu2 %2444, %v3078_v55   ;;  %v794_v37 = vmul.f32 %v769_v33, %v522_v6  ;;  %v849_v12 = vmax.f32 %v833_v48, 0.0  ;;  %v995_v57 = vsel %vm101_vm0, %v979_v8, 0.0 }
 0x24a   :  { %v814_v41 = vmul.f32 %v2996_v28, %v794_v37  ;;  %v1074_v37 = vmul.f32 %v3064_v4, %v3064_v4 }
 0x24c   :  { %962 = vmatmul.bf16.gmra.mxu1 %v858_v22  ;;  %v834_v45 = vadd.f32 %v3005_v0, %v814_v41 }
 0x24e   :  { %v850_v51 = vmax.f32 %v834_v45, 0.0 }
 0x250   :  { %v859_v17 = vpack.c.bf16 %v850_v51, %v849_v12 }
 0x25c   :  { %967 = vmatmul.bf16.gmra.mxu1 %v859_v17 }
 0x26a   :  { %1012 = vadd.xlane.f32.xlu1 %v995_v57 }
 0x26c   :  { %v943_v60 = vpop.f32.mrf.mxu1 }
 0x26d   :  { %v3092_v46 = vadd.f32 %v3057_v53, %v943_v60 }
 0x26f   :  { %v980_v31 = vmul.f32 %v3092_v46, %v3092_v46  ;;  %v3106_v62 = vmul.f32 0.01, %v3092_v46 }
 0x271   :  { %v996_v44 = vsel %vm101_vm0, %v980_v31, 0.0 }
 0x272   :  { %1014 = vadd.xlane.f32.xlu2 %v996_v44 }
 0x274   :  { %v945_v42 = vpop.f32.mrf.mxu1 }
 0x275   :  { %v3099_v47 = vadd.f32 %v3057_v53, %v945_v42 }
 0x277   :  { %v981_v61 = vmul.f32 %v3099_v47, %v3099_v47  ;;  %v3120_v32 = vmul.f32 0.01, %v3099_v47 }
 0x279   :  { %v997_v40 = vsel %vm101_vm0, %v981_v61, 0.0 }
 0x27a   :  { %1016 = vadd.xlane.f32.xlu0 %v997_v40  ;;  %v779_v5 = vpop.permute.xlu2 %778 }
 0x27b   :  { %v796_v7 = vmul.f32 %v779_v5, %v524_v38 }
 0x27c   :  { %v948_v15 = vpop.f32.mrf.mxu1 }
 0x27d   :  { %v3115_v59 = vadd.f32 %v3057_v53, %v948_v15  ;;  %v816_v56 = vmul.f32 %v2996_v28, %v796_v7 }
 0x27f   :  { %v3124_v2 = vmul.f32 0.01, %v3115_v59  ;;  %v836_v16 = vadd.f32 %v3005_v0, %v816_v56  ;;  %v982_v10 = vmul.f32 %v3115_v59, %v3115_v59 }
 0x281   :  { %v852_v58 = vmax.f32 %v836_v16, 0.0 }
 0x283   :  { %1134 = vperm.xlu1 %2442, %v3106_v62  }
 0x284   :  { %v950_v26 = vpop.f32.mrf.mxu1 }
 0x285   :  { %v3110_v43 = vadd.f32 %v3057_v53, %v950_v26 }
 0x287   :  { %v983_v1 = vmul.f32 %v3110_v43, %v3110_v43  ;;  %v3129_v9 = vmul.f32 0.01, %v3110_v43 }
 0x289   :  { %v999_v34 = vsel %vm101_vm0, %v983_v1, 0.0 }
 0x28a   :  { %1020 = vadd.xlane.f32.xlu2 %v999_v34 }
 0x28b   :  { %1139 = vperm.xlu1 %2442, %v3120_v32  }
 0x28c   :  { %v953_v63 = vpop.f32.mrf.mxu1 }
 0x28d   :  { %v3138_v23 = vadd.f32 %v3057_v53, %v953_v63 }
 0x28e   :  { %1144 = vperm.xlu0 %2443, %v3124_v2  }
 0x28f   :  { %v984_v27 = vmul.f32 %v3138_v23, %v3138_v23 }
 0x291   :  { %v1000_v20 = vsel %vm101_vm0, %v984_v27, 0.0 }
 0x294   :  { %v955_v50 = vpop.f32.mrf.mxu1 }
 0x2a2   :  { %1149 = vperm.xlu2 %2444, %v3129_v9   ;;  %v3192_v38 = vpop.permute.xlu2 %1129 }
 0x2a4   :  { %v774_v11 = vpop.permute.xlu1 %773 }
 0x2a5   :  { %v795_v13 = vmul.f32 %v774_v11, %v523_v21  ;;  %v1075_v21 = vmul.f32 %v3078_v55, %v3078_v55  ;;  %v1076_v55 = vmul.f32 %v3106_v62, %v3106_v62  ;;  %v1077_v62 = vmul.f32 %v3120_v32, %v3120_v32 }
 0x2a7   :  { %v815_v30 = vmul.f32 %v2996_v28, %v795_v13  ;;  %v3145_v28 = vadd.f32 %v3057_v53, %v955_v50 }
 0x2a9   :  { %v835_v54 = vadd.f32 %v3005_v0, %v815_v30  ;;  %v998_v0 = vsel %vm101_vm0, %v982_v10, 0.0  ;;  %v985_v29 = vmul.f32 %v3145_v28, %v3145_v28 }
 0x2ab   :  { %v851_v25 = vmax.f32 %v835_v54, 0.0  ;;  %v1001_v35 = vsel %vm101_vm0, %v985_v29, 0.0 }
 0x2ad   :  { %v860_v18 = vpack.c.bf16 %v852_v58, %v851_v25 }
 0x2af   :  { %972 = vmatmul.bf16.gmra.mxu1 %v860_v18 }
 0x2b2   :  { %v3183_v40 = vpop.permute.xlu1 %1124 }
 0x2b4   :  { %v1011_v6 = vpop.xlane.xlu0 %1010 }
 0x2b5   :  { %1018 = vadd.xlane.f32.xlu1 %v998_v0  ;;  %v1058_v36 = vmul.f32 0.01, %v1011_v6 }
 0x2b7   :  { %v1090_v22 = vsub.f32 %v1058_v36, %v1074_v37 }
 0x2b8   :  { %1022 = vadd.xlane.f32.xlu0 %v1000_v20 }
 0x2b9   :  { %v958_v33 = vpop.f32.mrf.mxu1  ;;  %v1106_v45 = vmax.f32 %v1090_v22, 0.0 }
 0x2ba   :  { %v3158_v24 = vadd.f32 %v3057_v53, %v958_v33 }
 0x2bb   :  { %v1218_v4 = vadd.f32 1e-05, %v1106_v45 }
 0x2bc   :  { %v986_v51 = vmul.f32 %v3158_v24, %v3158_v24 }
 0x2bd   :  { %1024 = vadd.xlane.f32.xlu1 %v1001_v35  ;;  %2488 = vrsqrt.f32 %v1218_v4  ;;  %vm1240_vm5 = vweird.f32 %v1218_v4 }
 0x2be   :  { %v1002_v8 = vsel %vm101_vm0, %v986_v51, 0.0 }
 0x2c1   :  { %v960_v39 = vpop.f32.mrf.mxu1 }
 0x2c2   :  { %v3161_v41 = vadd.f32 %v3057_v53, %v960_v39 }
 0x2c3   :  { %v2489_v42 = vpop.eup %2488 }
 0x2c4   :  { %v987_v52 = vmul.f32 %v3161_v41, %v3161_v41  ;;  %v1235_v15 = vmul.f32 %v2489_v42, %v1218_v4  ;;  %vm1241_vm4 = vweird.f32 %v2489_v42 }
 0x2c5   :  { %vm1242_vm6 = vmor %vm1240_vm5, %vm1241_vm4 }
 0x2c6   :  { %v1003_v48 = vsel %vm101_vm0, %v987_v52, 0.0  ;;  %v1236_v3 = vmul.f32 %v2489_v42, %v1235_v15 }
 0x2c7   :  { %1028 = vadd.xlane.f32.xlu0 %v1003_v48 }
 0x2c8   :  { %v1237_v13 = vmul.f32 0.5, %v1236_v3 }
 0x2c9   :  { %v963_v12 = vpop.f32.mrf.mxu1 }
 0x2ca   :  { %v3170_v17 = vadd.f32 %v3057_v53, %v963_v12  ;;  %v1238_v25 = vsub.f32 1.5, %v1237_v13 }
 0x2cb   :  { %1026 = vadd.xlane.f32.xlu2 %v1002_v8 }
 0x2cc   :  { %v988_v57 = vmul.f32 %v3170_v17, %v3170_v17  ;;  %v1239_v0 = vmul.f32 %v2489_v42, %v1238_v25  ;;  %v1079_v25 = vmul.f32 %v3129_v9, %v3129_v9 }
 0x2ce   :  { %v1004_v44 = vsel %vm101_vm0, %v988_v57, 0.0  ;;  %v1243_v33 = vsel %vm1242_vm6, %v2489_v42, %v1239_v0  ;;  %v1078_v0 = vmul.f32 %v3124_v2, %v3124_v2 }
 0x2d1   :  { %v965_v60 = vpop.f32.mrf.mxu1 }
 0x2d2   :  { %v3177_v31 = vadd.f32 %v3057_v53, %v965_v60 }
 0x2d3   :  { %1030 = vadd.xlane.f32.xlu2 %v1004_v44 }
 0x2d4   :  { %v989_v61 = vmul.f32 %v3177_v31, %v3177_v31 }
 0x2d6   :  { %v1005_v26 = vsel %vm101_vm0, %v989_v61, 0.0 }
 0x2d7   :  { %1032 = vadd.xlane.f32.xlu0 %v1005_v26 }
 0x2d9   :  { %v968_v1 = vpop.f32.mrf.mxu1 }
 0x2da   :  { %v3188_v34 = vadd.f32 %v3057_v53, %v968_v1 }
 0x2dc   :  { %v990_v5 = vmul.f32 %v3188_v34, %v3188_v34 }
 0x2dd   :  { %v1013_v7 = vpop.xlane.xlu1 %1012 }
 0x2de   :  { %v1059_v56 = vmul.f32 0.01, %v1013_v7  ;;  %v1006_v11 = vsel %vm101_vm0, %v990_v5, 0.0 }
 0x2df   :  { %1034 = vadd.xlane.f32.xlu1 %v1006_v11  ;;  %v1048_v11 = vmul.f32 0.01, %v3138_v23 }
 0x2e0   :  { %v1091_v63 = vsub.f32 %v1059_v56, %v1075_v21 }
 0x2e1   :  { %v970_v30 = vpop.f32.mrf.mxu1 }
 0x2e2   :  { %v1107_v16 = vmax.f32 %v1091_v63, 0.0  ;;  %v3199_v54 = vadd.f32 %v3057_v53, %v970_v30  ;;  %v1049_v63 = vmul.f32 0.01, %v3145_v28 }
 0x2e4   :  { %v1219_v58 = vadd.f32 1e-05, %v1107_v16  ;;  %v991_v18 = vmul.f32 %v3199_v54, %v3199_v54  ;;  %v1081_v2 = vmul.f32 %v1049_v63, %v1049_v63 }
 0x2e5   :  { %v1015_v10 = vpop.xlane.xlu2 %1014 }
 0x2e6   :  { %2490 = vrsqrt.f32 %v1219_v58  ;;  %v1060_v50 = vmul.f32 0.01, %v1015_v10  ;;  %v1007_v27 = vsel %vm101_vm0, %v991_v18, 0.0  ;;  %vm1250_vm8 = vweird.f32 %v1219_v58 }
 0x2e7   :  { %1036 = vadd.xlane.f32.xlu2 %v1007_v27 }
 0x2e8   :  { %v1092_v20 = vsub.f32 %v1060_v50, %v1076_v55 }
 0x2ea   :  { %v1108_v29 = vmax.f32 %v1092_v20, 0.0 }
 0x2eb   :  { %1396 = vperm.xlu0 %2443, %v1243_v33  }
 0x2ec   :  { %v2491_v6 = vpop.eup %2490  ;;  %v1220_v35 = vadd.f32 1e-05, %v1108_v29 }
 0x2ed   :  { %v1245_v36 = vmul.f32 %v2491_v6, %v1219_v58  ;;  %v1017_v37 = vpop.xlane.xlu0 %1016  ;;  %vm1251_vm7 = vweird.f32 %v2491_v6 }
 0x2ee   :  { %2492 = vrsqrt.f32 %v1220_v35  ;;  %v1061_v22 = vmul.f32 0.01, %v1017_v37  ;;  %vm1252_vm9 = vmor %vm1250_vm8, %vm1251_vm7  ;;  %vm1260_vm11 = vweird.f32 %v1220_v35 }
 0x2ef   :  { %v1246_v39 = vmul.f32 %v2491_v6, %v1245_v36 }
 0x2f0   :  { %v1093_v52 = vsub.f32 %v1061_v22, %v1077_v62 }
 0x2f1   :  { %v1247_v45 = vmul.f32 0.5, %v1246_v39 }
 0x2f2   :  { %v1109_v48 = vmax.f32 %v1093_v52, 0.0 }
 0x2f3   :  { %v1248_v51 = vsub.f32 1.5, %v1247_v45 }
 0x2f4   :  { %v2493_v4 = vpop.eup %2492  ;;  %v1221_v12 = vadd.f32 1e-05, %v1109_v48 }
 0x2f5   :  { %v1255_v8 = vmul.f32 %v2493_v4, %v1220_v35  ;;  %v1249_v57 = vmul.f32 %v2491_v6, %v1248_v51  ;;  %vm1261_vm10 = vweird.f32 %v2493_v4  ;;  %v3210_v13 = vpop.permute.xlu1 %1134 }
 0x2f6   :  { %2494 = vrsqrt.f32 %v1221_v12  ;;  %vm1262_vm12 = vmor %vm1260_vm11, %vm1261_vm10  ;;  %vm1270_vm14 = vweird.f32 %v1221_v12 }
 0x2f7   :  { %v1253_v60 = vsel %vm1252_vm9, %v2491_v6, %v1249_v57  ;;  %v1256_v44 = vmul.f32 %v2493_v4, %v1255_v8  ;;  %v1080_v6 = vmul.f32 %v1048_v11, %v1048_v11 }
 0x2f8   :  { %1401 = vperm.xlu1 %2442, %v1253_v60   ;;  %v2434_v60 = vld [vmem:[#allocation7 + $0x38] sm:$0xff] }
 0x2f9   :  { %v1257_v42 = vmul.f32 0.5, %v1256_v44  ;;  %1622 = vmatpush.bf16.msra.mxu2 %v2434_v60 }
 0x2fb   :  { %v1258_v61 = vsub.f32 1.5, %v1257_v42 }
 0x2fc   :  { %v2495_v32 = vpop.eup %2494 }
 0x2fd   :  { %v1265_v15 = vmul.f32 %v2495_v32, %v1221_v12  ;;  %v1259_v26 = vmul.f32 %v2493_v4, %v1258_v61  ;;  %vm1271_vm13 = vweird.f32 %v2495_v32  ;;  %v1021_v30 = vpop.xlane.xlu2 %1020  ;;  %v3215_v58 = vpop.permute.xlu1 %1139 }
 0x2fe   :  { %vm1272_vm15 = vmor %vm1270_vm14, %vm1271_vm13  ;;  %v1063_v16 = vmul.f32 0.01, %v1021_v30 }
 0x2ff   :  { %v1263_v1 = vsel %vm1262_vm12, %v2493_v4, %v1259_v26  ;;  %v1266_v3 = vmul.f32 %v2495_v32, %v1265_v15 }
 0x300   :  { %1406 = vperm.xlu1 %2442, %v1263_v1   ;;  %v1095_v18 = vsub.f32 %v1063_v16, %v1079_v25  ;;  %v3217_v55 = vpop.permute.xlu0 %1144  ;;  %v2433_v1 = vld [vmem:[#allocation7 + $0x30] sm:$0xff] }
 0x301   :  { %v1267_v5 = vmul.f32 0.5, %v1266_v3  ;;  %1623 = vmatpush.bf16.msra.mxu2 %v2433_v1 }
 0x302   :  { %v1111_v10 = vmax.f32 %v1095_v18, 0.0 }
 0x303   :  { %v1268_v7 = vsub.f32 1.5, %v1267_v5 }
 0x304   :  { %v3219_v27 = vadd.f32 1e-05, %v1111_v10  ;;  %v2432_v10 = vld [vmem:[#allocation7 + $0x28] sm:$0xff] }
 0x305   :  { %v1269_v21 = vmul.f32 %v2495_v32, %v1268_v7  ;;  %v3235_v42 = vpop.permute.xlu2 %1149  ;;  %1624 = vmatpush.bf16.msra.mxu2 %v2432_v10 }
 0x306   :  { %2496 = vrsqrt.f32 %v3219_v27  ;;  %vm1290_vm9 = vweird.f32 %v3219_v27 }
 0x307   :  { %v1273_v56 = vsel %vm1272_vm15, %v2495_v32, %v1269_v21  ;;  %v3238_v32 = vmul.f32 0.01, %v3161_v41 }
 0x308   :  { %1411 = vperm.xlu1 %2442, %v1273_v56   ;;  %v3245_v56 = vmul.f32 0.01, %v3158_v24 }
 0x30c   :  { %v3231_v12 = vpop.eup %2496 }
 0x30d   :  { %v1285_v44 = vmul.f32 %v3231_v12, %v3219_v27  ;;  %vm1291_vm7 = vweird.f32 %v3231_v12 }
 0x30e   :  { %vm1292_vm11 = vmor %vm1290_vm9, %vm1291_vm7 }
 0x30f   :  { %v1286_v21 = vmul.f32 %v3231_v12, %v1285_v44 }
 0x310   :  { %1154 = vperm.xlu1 %2442, %v1048_v11  }
 0x318   :  { %1159 = vperm.xlu1 %2442, %v1049_v63   ;;  %v1083_v63 = vmul.f32 %v3238_v32, %v3238_v32 }
 0x328   :  { %v1019_v50 = vpop.xlane.xlu1 %1018 }
 0x329   :  { %v1062_v20 = vmul.f32 0.01, %v1019_v50 }
 0x32b   :  { %v1094_v29 = vsub.f32 %v1062_v20, %v1078_v0  ;;  %v1023_v33 = vpop.xlane.xlu0 %1022  ;;  %v1287_v20 = vmul.f32 0.5, %v1286_v21 }
 0x32c   :  { %v1064_v35 = vmul.f32 0.01, %v1023_v33  ;;  %v973_v36 = vpop.f32.mrf.mxu1 }
 0x32d   :  { %v1110_v9 = vmax.f32 %v1094_v29, 0.0  ;;  %v3225_v37 = vadd.f32 %v3057_v53, %v973_v36 }
 0x32e   :  { %v1096_v62 = vsub.f32 %v1064_v35, %v1080_v6  ;;  %v1082_v6 = vmul.f32 %v3245_v56, %v3245_v56 }
 0x32f   :  { %v1222_v22 = vadd.f32 1e-05, %v1110_v9  ;;  %v992_v39 = vmul.f32 %v3225_v37, %v3225_v37 }
 0x330   :  { %v1112_v52 = vmax.f32 %v1096_v62, 0.0  ;;  %v1025_v45 = vpop.xlane.xlu1 %1024 }
 0x331   :  { %2498 = vrsqrt.f32 %v1222_v22  ;;  %v1065_v48 = vmul.f32 0.01, %v1025_v45  ;;  %v1008_v51 = vsel %vm101_vm0, %v992_v39, 0.0  ;;  %vm1280_vm2 = vweird.f32 %v1222_v22 }
 0x332   :  { %v1224_v4 = vadd.f32 1e-05, %v1112_v52  ;;  %1038 = vadd.xlane.f32.xlu2 %v1008_v51 }
 0x333   :  { %v1097_v8 = vsub.f32 %v1065_v48, %v1081_v2  ;;  %v2431_v2 = vld [vmem:[#allocation7 + $0x20] sm:$0xff]  ;;  %v1052_v48 = vmul.f32 0.01, %v3170_v17 }
 0x334   :  { %2500 = vrsqrt.f32 %v1224_v4  ;;  %vm1300_vm5 = vweird.f32 %v1224_v4  ;;  %1625 = vmatpush.bf16.msra.mxu2 %v2431_v2  ;;  %v2427_v2 = vld [vmem:[#allocation7] sm:$0xff] }
 0x335   :  { %v1113_v57 = vmax.f32 %v1097_v8, 0.0 }
 0x337   :  { %v2499_v61 = vpop.eup %2498  ;;  %v3240_v15 = vadd.f32 1e-05, %v1113_v57  ;;  %v1288_v57 = vsub.f32 1.5, %v1287_v20 }
 0x338   :  { %v1275_v26 = vmul.f32 %v2499_v61, %v1222_v22  ;;  %vm1281_vm1 = vweird.f32 %v2499_v61 }
 0x339   :  { %2502 = vrsqrt.f32 %v3240_v15  ;;  %vm1282_vm3 = vmor %vm1280_vm2, %vm1281_vm1  ;;  %vm1310_vm10 = vweird.f32 %v3240_v15 }
 0x33a   :  { %v2501_v3 = vpop.eup %2500  ;;  %v1029_v5 = vpop.xlane.xlu0 %1028  ;;  %v1276_v7 = vmul.f32 %v2499_v61, %v1275_v26 }
 0x33b   :  { %v1295_v11 = vmul.f32 %v2501_v3, %v1224_v4  ;;  %v1067_v30 = vmul.f32 0.01, %v1029_v5  ;;  %vm1301_vm4 = vweird.f32 %v2501_v3  ;;  %v2430_v5 = vld [vmem:[#allocation7 + $0x18] sm:$0xff] }
 0x33c   :  { %v1277_v16 = vmul.f32 0.5, %v1276_v7  ;;  %vm1302_vm6 = vmor %vm1300_vm5, %vm1301_vm4  ;;  %v1084_v7 = vmul.f32 %v1052_v48, %v1052_v48  ;;  %1626 = vmatpush.bf16.msra.mxu2 %v2430_v5 }
 0x33d   :  { %v1099_v25 = vsub.f32 %v1067_v30, %v1083_v63  ;;  %v1296_v18 = vmul.f32 %v2501_v3, %v1295_v11  ;;  %v1289_v11 = vmul.f32 %v3231_v12, %v1288_v57  ;;  %v3259_v63 = vmul.f32 0.01, %v3177_v31 }
 0x33e   :  { %v1027_v50 = vpop.xlane.xlu2 %1026  ;;  %v1278_v0 = vsub.f32 1.5, %v1277_v16 }
 0x33f   :  { %v2503_v29 = vpop.eup %2502  ;;  %v1115_v33 = vmax.f32 %v1099_v25, 0.0  ;;  %v1066_v35 = vmul.f32 0.01, %v1027_v50  ;;  %v1297_v36 = vmul.f32 0.5, %v1296_v18  ;;  %v2429_v25 = vld [vmem:[#allocation7 + $0x10] sm:$0xff]  ;;  %v1293_v50 = vsel %vm1292_vm11, %v3231_v12, %v1289_v11 }
 0x340   :  { %v1305_v9 = vmul.f32 %v2503_v29, %v3240_v15  ;;  %v1279_v62 = vmul.f32 %v2499_v61, %v1278_v0  ;;  %vm1311_vm8 = vweird.f32 %v2503_v29  ;;  %v1085_v27 = vmul.f32 %v3259_v63, %v3259_v63  ;;  %1627 = vmatpush.bf16.msra.mxu2 %v2429_v25 }
 0x341   :  { %v3252_v39 = vadd.f32 1e-05, %v1115_v33  ;;  %v1098_v52 = vsub.f32 %v1066_v35, %v1082_v6  ;;  %v1298_v45 = vsub.f32 1.5, %v1297_v36  ;;  %vm1312_vm12 = vmor %vm1310_vm10, %vm1311_vm8  ;;  %v2428_v36 = vld [vmem:[#allocation7 + $0x8] sm:$0xff]  ;;  %v3276_v12 = vmul.f32 0.01, %v3188_v34 }
 0x342   :  { %v1283_v51 = vsel %vm1282_vm3, %v2499_v61, %v1279_v62  ;;  %v1306_v8 = vmul.f32 %v2503_v29, %v1305_v9 }
 0x343   :  { %2504 = vrsqrt.f32 %v3252_v39  ;;  %v1114_v60 = vmax.f32 %v1098_v52, 0.0  ;;  %1416 = vperm.xlu0 %2443, %v1283_v51   ;;  %v1299_v44 = vmul.f32 %v2501_v3, %v1298_v45  ;;  %v1086_v57 = vmul.f32 %v3276_v12, %v3276_v12 }
 0x344   :  { %v1307_v22 = vmul.f32 0.5, %v1306_v8  ;;  %1628 = vmatpush.bf16.msra.mxu2 %v2428_v36  ;;  %vm1330_vm2 = vweird.f32 %v3252_v39  ;;  %v1202_v36 = vsub.f32 %v3060_v14, %v3183_v40  ;;  %v1203_v14 = vsub.f32 %v3074_v49, %v3192_v38  ;;  %v975_v40 = vpop.f32.mrf.mxu1 }
 0x345   :  { %v1226_v26 = vadd.f32 1e-05, %v1114_v60  ;;  %v1303_v1 = vsel %vm1302_vm6, %v2501_v3, %v1299_v44 }
 0x346   :  { %v1031_v21 = vpop.xlane.xlu2 %1030  ;;  %1426 = vperm.xlu1 %2442, %v1303_v1   ;;  %v1308_v61 = vsub.f32 1.5, %v1307_v22 }
 0x347   :  { %2506 = vrsqrt.f32 %v1226_v26  ;;  %v1068_v4 = vmul.f32 0.01, %v1031_v21  ;;  %vm1320_vm14 = vweird.f32 %v1226_v26 }
 0x348   :  { %v1309_v30 = vmul.f32 %v2503_v29, %v1308_v61  ;;  %1629 = vmatpush.bf16.msra.mxu2 %v2427_v2 }
 0x349   :  { %v3265_v3 = vpop.eup %2504  ;;  %v1100_v16 = vsub.f32 %v1068_v4, %v1084_v7 }
 0x34a   :  { %v1033_v18 = vpop.xlane.xlu0 %1032  ;;  %v1313_v10 = vsel %vm1312_vm12, %v2503_v29, %v1309_v30  ;;  %v1325_v15 = vmul.f32 %v3265_v3, %v3252_v39  ;;  %vm1331_vm1 = vweird.f32 %v3265_v3 }
 0x34b   :  { %v1116_v0 = vmax.f32 %v1100_v16, 0.0  ;;  %v1069_v20 = vmul.f32 0.01, %v1033_v18  ;;  %1431 = vperm.xlu2 %2444, %v1313_v10   ;;  %1421 = vperm.xlu0 %2443, %v1293_v50   ;;  %vm1332_vm3 = vmor %vm1330_vm2, %vm1331_vm1 }
 0x34c   :  { %v1326_v52 = vmul.f32 %v3265_v3, %v1325_v15 }
 0x34d   :  { %v2507_v33 = vpop.eup %2506  ;;  %v3272_v6 = vadd.f32 1e-05, %v1116_v0  ;;  %v1101_v35 = vsub.f32 %v1069_v20, %v1085_v27 }
 0x34e   :  { %v1315_v9 = vmul.f32 %v2507_v33, %v1226_v26  ;;  %1169 = vperm.xlu1 %2442, %v3238_v32   ;;  %vm1321_vm13 = vweird.f32 %v2507_v33  ;;  %v1327_v44 = vmul.f32 0.5, %v1326_v52 }
 0x34f   :  { %2508 = vrsqrt.f32 %v3272_v6  ;;  %v1117_v29 = vmax.f32 %v1101_v35, 0.0  ;;  %vm1322_vm15 = vmor %vm1320_vm14, %vm1321_vm13  ;;  %vm1340_vm8 = vweird.f32 %v3272_v6 }
 0x350   :  { %v1316_v62 = vmul.f32 %v2507_v33, %v1315_v9  ;;  %v1328_v11 = vsub.f32 1.5, %v1327_v44 }
 0x351   :  { %v1229_v45 = vadd.f32 1e-05, %v1117_v29 }
 0x352   :  { %v1035_v51 = vpop.xlane.xlu1 %1034  ;;  %v1317_v8 = vmul.f32 0.5, %v1316_v62 }
 0x353   :  { %2510 = vrsqrt.f32 %v1229_v45  ;;  %v1070_v60 = vmul.f32 0.01, %v1035_v51  ;;  %1174 = vperm.xlu2 %2444, %v1052_v48   ;;  %v1329_v48 = vmul.f32 %v3265_v3, %v1328_v11  ;;  %vm1350_vm5 = vweird.f32 %v1229_v45 }
 0x354   :  { %v1318_v32 = vsub.f32 1.5, %v1317_v8  ;;  %v3301_v8 = vld [vmem:[%s3687_s8] ss:$0 sm:$0xff] }
 0x355   :  { %v2509_v22 = vpop.eup %2508  ;;  %v1102_v1 = vsub.f32 %v1070_v60, %v1086_v57  ;;  %v1333_v26 = vsel %vm1332_vm3, %v3265_v3, %v1329_v48  ;;  %v3292_v3 = vld [vmem:[%s3686_s7] ss:$0 sm:$0xff] }
 0x356   :  { %v1335_v5 = vmul.f32 %v2509_v22, %v3272_v6  ;;  %v1319_v7 = vmul.f32 %v2507_v33, %v1318_v32  ;;  %vm1341_vm7 = vweird.f32 %v2509_v22  ;;  %v3304_v32 = vadd.f32 %v3057_v53, %v975_v40 }
 0x357   :  { %v1118_v21 = vmax.f32 %v1102_v1, 0.0  ;;  %vm1342_vm9 = vmor %vm1340_vm8, %vm1341_vm7  ;;  %v1204_v53 = vsub.f32 %v3092_v46, %v3210_v13  ;;  %v1205_v46 = vsub.f32 %v3099_v47, %v3215_v58 }
 0x358   :  { %v1323_v61 = vsel %vm1322_vm15, %v2507_v33, %v1319_v7  ;;  %v1336_v4 = vmul.f32 %v2509_v22, %v1335_v5  ;;  %v993_v7 = vmul.f32 %v3304_v32, %v3304_v32 }
 0x359   :  { %v2511_v30 = vpop.eup %2510  ;;  %v1230_v16 = vadd.f32 1e-05, %v1118_v21  ;;  %1436 = vperm.xlu1 %2442, %v1323_v61  }
 0x35a   :  { %v1345_v25 = vmul.f32 %v2511_v30, %v1229_v45  ;;  %v1337_v10 = vmul.f32 0.5, %v1336_v4  ;;  %vm1351_vm4 = vweird.f32 %v2511_v30  ;;  %v1037_v5 = vpop.xlane.xlu2 %1036 }
 0x35b   :  { %2512 = vrsqrt.f32 %v1230_v16  ;;  %vm1352_vm6 = vmor %vm1350_vm5, %vm1351_vm4  ;;  %vm1360_vm11 = vweird.f32 %v1230_v16  ;;  %v1071_v4 = vmul.f32 0.01, %v1037_v5 }
 0x35c   :  { %v1346_v18 = vmul.f32 %v2511_v30, %v1345_v25  ;;  %v1338_v27 = vsub.f32 1.5, %v1337_v10  ;;  %v1009_v25 = vsel %vm101_vm0, %v993_v7, 0.0 }
 0x35d   :  { %v1397_v33 = vpop.permute.xlu0 %1396 }
 0x35e   :  { %v1347_v50 = vmul.f32 0.5, %v1346_v18  ;;  %v1339_v29 = vmul.f32 %v2509_v22, %v1338_v27  ;;  %v1474_v62 = vmul.f32 %v1397_v33, %v1202_v36 }
 0x360   :  { %v1348_v0 = vsub.f32 1.5, %v1347_v50  ;;  %v1343_v45 = vsel %vm1342_vm9, %v2509_v22, %v1339_v29  ;;  %v1494_v51 = vmul.f32 %v3292_v3, %v1474_v62  ;;  %v1055_v22 = vmul.f32 0.01, %v3199_v54 }
 0x361   :  { %v2513_v20 = vpop.eup %2512  ;;  %1441 = vperm.xlu1 %2442, %v1333_v26   ;;  %v1056_v50 = vmul.f32 0.01, %v3225_v37 }
 0x362   :  { %v1355_v15 = vmul.f32 %v2513_v20, %v1230_v16  ;;  %v1349_v35 = vmul.f32 %v2511_v30, %v1348_v0  ;;  %vm1361_vm10 = vweird.f32 %v2513_v20  ;;  %v1514_v38 = vadd.f32 %v3301_v8, %v1494_v51 }
 0x363   :  { %vm1362_vm12 = vmor %vm1360_vm11, %vm1361_vm10  ;;  %v1087_v48 = vmul.f32 %v1055_v22, %v1055_v22  ;;  %v1088_v40 = vmul.f32 %v1056_v50, %v1056_v50 }
 0x364   :  { %v1353_v9 = vsel %vm1352_vm6, %v2511_v30, %v1349_v35  ;;  %v1356_v39 = vmul.f32 %v2513_v20, %v1355_v15  ;;  %v1530_v21 = vmax.f32 %v1514_v38, 0.0  ;;  %v3315_v30 = vmul.f32 0.01, %v3304_v32 }
 0x365   :  { %1451 = vperm.xlu2 %2444, %v1353_v9   ;;  %v1103_v10 = vsub.f32 %v1071_v4, %v1087_v48 }
 0x366   :  { %v1357_v52 = vmul.f32 0.5, %v1356_v39 }
 0x367   :  { %v1119_v0 = vmax.f32 %v1103_v10, 0.0 }
 0x368   :  { %v1358_v2 = vsub.f32 1.5, %v1357_v52 }
 0x369   :  { %1446 = vperm.xlu1 %2442, %v1343_v45   ;;  %v1231_v33 = vadd.f32 1e-05, %v1119_v0 }
 0x36a   :  { %v1402_v57 = vpop.permute.xlu1 %1401  ;;  %v1359_v60 = vmul.f32 %v2513_v20, %v1358_v2 }
 0x36b   :  { %v1475_v6 = vmul.f32 %v1402_v57, %v1203_v14  ;;  %2514 = vrsqrt.f32 %v1231_v33  ;;  %vm1370_vm14 = vweird.f32 %v1231_v33 }
 0x36c   :  { %v1363_v44 = vsel %vm1362_vm12, %v2513_v20, %v1359_v60 }
 0x36d   :  { %v1495_v49 = vmul.f32 %v3292_v3, %v1475_v6  ;;  %1456 = vperm.xlu2 %2444, %v1363_v44  }
 0x36f   :  { %v1515_v1 = vadd.f32 %v3301_v8, %v1495_v49 }
 0x371   :  { %1189 = vperm.xlu1 %2442, %v1055_v22   ;;  %v1531_v61 = vmax.f32 %v1515_v1, 0.0  ;;  %v2515_v39 = vpop.eup %2514 }
 0x372   :  { %v1407_v11 = vpop.permute.xlu1 %1406  ;;  %v1365_v47 = vmul.f32 %v2515_v39, %v1231_v33  ;;  %vm1371_vm13 = vweird.f32 %v2515_v39 }
 0x373   :  { %v1546_v16 = vpack.c.bf16 %v1531_v61, %v1530_v21  ;;  %v1476_v18 = vmul.f32 %v1407_v11, %v1204_v53  ;;  %vm1372_vm15 = vmor %vm1370_vm14, %vm1371_vm13  ;;  %v1207_v21 = vsub.f32 %v3110_v43, %v3235_v42 }
 0x374   :  { %v1366_v58 = vmul.f32 %v2515_v39, %v1365_v47 }
 0x375   :  { %1040 = vadd.xlane.f32.xlu0 %v1009_v25  ;;  %1199 = vperm.xlu2 %2444, %v3315_v30   ;;  %v1496_v13 = vmul.f32 %v3292_v3, %v1476_v18 }
 0x376   :  { %1630 = vmatmul.bf16.vlgmr.msra.gmra.mxu2 %v1546_v16  ;;  %v1367_v62 = vmul.f32 0.5, %v1366_v58 }
 0x377   :  { %v1516_v15 = vadd.f32 %v3301_v8, %v1496_v13 }
 0x378   :  { %v1368_v52 = vsub.f32 1.5, %v1367_v62 }
 0x379   :  { %1194 = vperm.xlu1 %2442, %v1056_v50   ;;  %v1532_v36 = vmax.f32 %v1516_v15, 0.0 }
 0x37a   :  { %v1412_v26 = vpop.permute.xlu1 %1411  ;;  %v1369_v45 = vmul.f32 %v2515_v39, %v1368_v52 }
 0x37b   :  { %v1477_v27 = vmul.f32 %v1412_v26, %v1205_v46 }
 0x37c   :  { %v1373_v2 = vsel %vm1372_vm15, %v2515_v39, %v1369_v45 }
 0x37d   :  { %v1497_v20 = vmul.f32 %v3292_v3, %v1477_v27 }
 0x37f   :  { %v1517_v35 = vadd.f32 %v3301_v8, %v1497_v20 }
 0x381   :  { %v1533_v9 = vmax.f32 %v1517_v35, 0.0 }
 0x382   :  { %v1155_v6 = vpop.permute.xlu1 %1154 }
 0x383   :  { %v1547_v29 = vpack.c.bf16 %v1533_v9, %v1532_v36  ;;  %v1208_v18 = vsub.f32 %v3138_v23, %v1155_v6 }
 0x386   :  { %1635 = vmatmul.bf16.gmra.mxu2 %v1547_v29 }
 0x389   :  { %1164 = vperm.xlu0 %2443, %v3245_v56  }
 0x38a   :  { %v1160_v5 = vpop.permute.xlu1 %1159 }
 0x38b   :  { %v1209_v50 = vsub.f32 %v3145_v28, %v1160_v5  ;;  %v1089_v28 = vmul.f32 %v3315_v30, %v3315_v30 }
 0x391   :  { %1179 = vperm.xlu0 %2443, %v3259_v63  }
 0x399   :  { %1184 = vperm.xlu0 %2443, %v3276_v12   ;;  %v1206_v12 = vsub.f32 %v3115_v59, %v3217_v55 }
 0x3a1   :  { %1461 = vperm.xlu0 %2443, %v1373_v2  }
 0x3a5   :  { %v1039_v14 = vpop.xlane.xlu2 %1038 }
 0x3a6   :  { %v1072_v51 = vmul.f32 0.01, %v1039_v14 }
 0x3a8   :  { %v1104_v57 = vsub.f32 %v1072_v51, %v1088_v40 }
 0x3aa   :  { %v1120_v60 = vmax.f32 %v1104_v57, 0.0 }
 0x3ac   :  { %v1232_v56 = vadd.f32 1e-05, %v1120_v60 }
 0x3ad   :  { %v1432_v42 = vpop.permute.xlu2 %1431 }
 0x3ae   :  { %2516 = vrsqrt.f32 %v1232_v56  ;;  %vm1380_vm2 = vweird.f32 %v1232_v56  ;;  %v1481_v26 = vmul.f32 %v1432_v42, %v1209_v50 }
 0x3b0   :  { %v1501_v27 = vmul.f32 %v3292_v3, %v1481_v26 }
 0x3b2   :  { %v1521_v15 = vadd.f32 %v3301_v8, %v1501_v27 }
 0x3b4   :  { %v2517_v44 = vpop.eup %2516  ;;  %v1537_v35 = vmax.f32 %v1521_v15, 0.0 }
 0x3b5   :  { %v1375_v63 = vmul.f32 %v2517_v44, %v1232_v56  ;;  %v1417_v49 = vpop.permute.xlu0 %1416  ;;  %vm1381_vm1 = vweird.f32 %v2517_v44 }
 0x3b6   :  { %v1478_v22 = vmul.f32 %v1417_v49, %v1206_v12  ;;  %vm1382_vm3 = vmor %vm1380_vm2, %vm1381_vm1 }
 0x3b7   :  { %v1376_v38 = vmul.f32 %v2517_v44, %v1375_v63 }
 0x3b8   :  { %v1498_v61 = vmul.f32 %v3292_v3, %v1478_v22  ;;  %v1427_v48 = vpop.permute.xlu1 %1426 }
 0x3b9   :  { %v1377_v1 = vmul.f32 0.5, %v1376_v38  ;;  %v1480_v46 = vmul.f32 %v1427_v48, %v1208_v18 }
 0x3ba   :  { %v1518_v59 = vadd.f32 %v3301_v8, %v1498_v61 }
 0x3bb   :  { %v1378_v7 = vsub.f32 1.5, %v1377_v1  ;;  %v1500_v0 = vmul.f32 %v3292_v3, %v1480_v46 }
 0x3bc   :  { %v1534_v10 = vmax.f32 %v1518_v59, 0.0 }
 0x3bd   :  { %v1422_v11 = vpop.permute.xlu0 %1421  ;;  %v1379_v53 = vmul.f32 %v2517_v44, %v1378_v7  ;;  %v1520_v20 = vadd.f32 %v3301_v8, %v1500_v0 }
 0x3be   :  { %v1479_v4 = vmul.f32 %v1422_v11, %v1207_v21 }
 0x3bf   :  { %v1383_v16 = vsel %vm1382_vm3, %v2517_v44, %v1379_v53  ;;  %v1536_v33 = vmax.f32 %v1520_v20, 0.0  ;;  %v1175_v44 = vpop.permute.xlu2 %1174 }
 0x3c0   :  { %v1499_v25 = vmul.f32 %v3292_v3, %v1479_v4  ;;  %1466 = vperm.xlu0 %2443, %v1383_v16   ;;  %v1170_v36 = vpop.permute.xlu1 %1169  ;;  %v1212_v4 = vsub.f32 %v3170_v17, %v1175_v44 }
 0x3c1   :  { %v1549_v23 = vpack.c.bf16 %v1537_v35, %v1536_v33  ;;  %v1211_v45 = vsub.f32 %v3161_v41, %v1170_v36 }
 0x3c2   :  { %v1519_v55 = vadd.f32 %v3301_v8, %v1499_v25 }
 0x3c4   :  { %v1535_v43 = vmax.f32 %v1519_v55, 0.0 }
 0x3c6   :  { %v1548_v13 = vpack.c.bf16 %v1535_v43, %v1534_v10 }
 0x3c7   :  { %v1452_v11 = vpop.permute.xlu2 %1451 }
 0x3c8   :  { %1640 = vmatmul.bf16.gmra.mxu2 %v1548_v13 }
 0x3cb   :  { %v1437_v39 = vpop.permute.xlu1 %1436 }
 0x3cf   :  { %v1457_v36 = vpop.permute.xlu2 %1456 }
 0x3d3   :  { %v1442_v52 = vpop.permute.xlu1 %1441 }
 0x3d4   :  { %v1483_v14 = vmul.f32 %v1442_v52, %v1211_v45 }
 0x3d6   :  { %v1503_v56 = vmul.f32 %v3292_v3, %v1483_v14 }
 0x3d8   :  { %1645 = vmatmul.bf16.gmra.mxu2 %v1549_v23  ;;  %v1523_v41 = vadd.f32 %v3301_v8, %v1503_v56 }
 0x3da   :  { %v1539_v61 = vmax.f32 %v1523_v41, 0.0 }
 0x3db   :  { %v1447_v53 = vpop.permute.xlu1 %1446 }
 0x3dc   :  { %v1484_v59 = vmul.f32 %v1447_v53, %v1212_v4 }
 0x3de   :  { %v1504_v10 = vmul.f32 %v3292_v3, %v1484_v59 }
 0x3e0   :  { %v1524_v42 = vadd.f32 %v3301_v8, %v1504_v10 }
 0x3e2   :  { %v1540_v15 = vmax.f32 %v1524_v42, 0.0 }
 0x3e3   :  { %v1190_v17 = vpop.permute.xlu1 %1189 }
 0x3e4   :  { %v1215_v0 = vsub.f32 %v3199_v54, %v1190_v17 }
 0x3e8   :  { %v1041_v9 = vpop.xlane.xlu0 %1040 }
 0x3e9   :  { %v1073_v29 = vmul.f32 0.01, %v1041_v9 }
 0x3eb   :  { %v1105_v47 = vsub.f32 %v1073_v29, %v1089_v28 }
 0x3ed   :  { %v1121_v58 = vmax.f32 %v1105_v47, 0.0 }
 0x3ef   :  { %v1233_v62 = vadd.f32 1e-05, %v1121_v58 }
 0x3f1   :  { %2518 = vrsqrt.f32 %v1233_v62  ;;  %vm1390_vm5 = vweird.f32 %v1233_v62 }
 0x3f7   :  { %v2519_v2 = vpop.eup %2518 }
 0x3f8   :  { %v1385_v40 = vmul.f32 %v2519_v2, %v1233_v62  ;;  %vm1391_vm4 = vweird.f32 %v2519_v2 }
 0x3f9   :  { %v3347_v51 = vpop.f32.mrf.mxu2  ;;  %vm1392_vm6 = vmor %vm1390_vm5, %vm1391_vm4 }
 0x3fa   :  { %v1386_v57 = vmul.f32 %v2519_v2, %v1385_v40 }
 0x3fb   :  { %v1165_v60 = vpop.permute.xlu0 %1164 }
 0x3fc   :  { %v1210_v30 = vsub.f32 %v3158_v24, %v1165_v60  ;;  %v1387_v6 = vmul.f32 0.5, %v1386_v57 }
 0x3fe   :  { %v1482_v63 = vmul.f32 %v1437_v39, %v1210_v30  ;;  %v1388_v49 = vsub.f32 1.5, %v1387_v6 }
 0x400   :  { %v1502_v12 = vmul.f32 %v3292_v3, %v1482_v63  ;;  %v1389_v38 = vmul.f32 %v2519_v2, %v1388_v49 }
 0x401   :  { %v3353_v22 = vpop.f32.mrf.mxu2 }
 0x402   :  { %v1393_v1 = vsel %vm1392_vm6, %v2519_v2, %v1389_v38  ;;  %v1522_v5 = vadd.f32 %v3301_v8, %v1502_v12 }
 0x403   :  { %1471 = vperm.xlu1 %2442, %v1393_v1   ;;  %v1180_v7 = vpop.permute.xlu0 %1179 }
 0x404   :  { %v1213_v24 = vsub.f32 %v3177_v31, %v1180_v7  ;;  %v1538_v21 = vmax.f32 %v1522_v5, 0.0  ;;  %v3364_v31 = vld [vmem:[%s3689_s10] ss:$0 sm:$0xff]  ;;  %v1195_v7 = vpop.permute.xlu1 %1194 }
 0x406   :  { %v1485_v16 = vmul.f32 %v1452_v11, %v1213_v24  ;;  %v1550_v25 = vpack.c.bf16 %v1539_v61, %v1538_v21  ;;  %v1216_v21 = vsub.f32 %v3225_v37, %v1195_v7  ;;  %v1200_v11 = vpop.permute.xlu2 %1199 }
 0x407   :  { %v1217_v53 = vsub.f32 %v3304_v32, %v1200_v11 }
 0x408   :  { %1650 = vmatmul.bf16.gmra.mxu2 %v1550_v25  ;;  %v1505_v48 = vmul.f32 %v3292_v3, %v1485_v16 }
 0x409   :  { %v1636_v55 = vpop.f32.mrf.mxu2 }
 0x40a   :  { %v1525_v43 = vadd.f32 %v3301_v8, %v1505_v48  ;;  %v3381_v47 = vadd.f32 %v3364_v31, %v1636_v55 }
 0x40b   :  { %v1185_v18 = vpop.permute.xlu0 %1184 }
 0x40c   :  { %v1541_v13 = vmax.f32 %v1525_v43, 0.0  ;;  %v1214_v27 = vsub.f32 %v3188_v34, %v1185_v18  ;;  %v1673_v52 = vmul.f32 %v3381_v47, %v3381_v47 }
 0x40e   :  { %v1551_v23 = vpack.c.bf16 %v1541_v13, %v1540_v15  ;;  %v1486_v9 = vmul.f32 %v1457_v36, %v1214_v27  ;;  %v1689_v45 = vsel %vm101_vm0, %v1673_v52, 0.0 }
 0x410   :  { %v1506_v29 = vmul.f32 %v3292_v3, %v1486_v9 }
 0x411   :  { %v1638_v50 = vpop.f32.mrf.mxu2 }
 0x412   :  { %v3368_v46 = vadd.f32 %v3364_v31, %v1638_v50  ;;  %v1526_v34 = vadd.f32 %v3301_v8, %v1506_v29  ;;  %v3456_v29 = vadd.f32 %v3364_v31, %v3353_v22 }
 0x413   :  { %v1462_v26 = vpop.permute.xlu0 %1461 }
 0x414   :  { %v1674_v20 = vmul.f32 %v3368_v46, %v3368_v46  ;;  %v1487_v33 = vmul.f32 %v1462_v26, %v1215_v0  ;;  %v1542_v58 = vmax.f32 %v1526_v34, 0.0 }
 0x416   :  { %v1690_v35 = vsel %vm101_vm0, %v1674_v20, 0.0  ;;  %v1507_v28 = vmul.f32 %v3292_v3, %v1487_v33 }
 0x417   :  { %1709 = vadd.xlane.f32.xlu0 %v1690_v35 }
 0x418   :  { %1655 = vmatmul.bf16.gmra.mxu2 %v1551_v23  ;;  %v1527_v54 = vadd.f32 %v3301_v8, %v1507_v28 }
 0x41a   :  { %v1543_v39 = vmax.f32 %v1527_v54, 0.0 }
 0x41c   :  { %v1552_v62 = vpack.c.bf16 %v1543_v39, %v1542_v58  ;;  %v1672_v58 = vmul.f32 %v3456_v29, %v3456_v29 }
 0x41e   :  { %v1688_v22 = vsel %vm101_vm0, %v1672_v58, 0.0 }
 0x428   :  { %1660 = vmatmul.bf16.gmra.mxu2 %v1552_v62 }
 0x42d   :  { %1707 = vadd.xlane.f32.xlu1 %v1689_v45 }
 0x432   :  { %v1467_v24 = vpop.permute.xlu0 %1466 }
 0x433   :  { %v1488_v61 = vmul.f32 %v1467_v24, %v1216_v21 }
 0x435   :  { %v1508_v4 = vmul.f32 %v3292_v3, %v1488_v61 }
 0x437   :  { %v1528_v55 = vadd.f32 %v3301_v8, %v1508_v4 }
 0x439   :  { %v1544_v18 = vmax.f32 %v1528_v55, 0.0 }
 0x44b   :  { %v1641_v2 = vpop.f32.mrf.mxu2 }
 0x44c   :  { %v3388_v14 = vadd.f32 %v3364_v31, %v1641_v2 }
 0x44e   :  { %v1675_v40 = vmul.f32 %v3388_v14, %v3388_v14 }
 0x450   :  { %v1691_v57 = vsel %vm101_vm0, %v1675_v40, 0.0 }
 0x451   :  { %1711 = vadd.xlane.f32.xlu0 %v1691_v57 }
 0x453   :  { %v1643_v60 = vpop.f32.mrf.mxu2 }
 0x454   :  { %v3395_v56 = vadd.f32 %v3364_v31, %v1643_v60 }
 0x456   :  { %v1676_v30 = vmul.f32 %v3395_v56, %v3395_v56 }
 0x458   :  { %v1692_v6 = vsel %vm101_vm0, %v1676_v30, 0.0 }
 0x459   :  { %1713 = vadd.xlane.f32.xlu2 %v1692_v6 }
 0x45b   :  { %v1646_v44 = vpop.f32.mrf.mxu2 }
 0x45c   :  { %v3402_v63 = vadd.f32 %v3364_v31, %v1646_v44  ;;  %v3486_v44 = vadd.f32 %v3364_v31, %v3347_v51 }
 0x45e   :  { %v1677_v49 = vmul.f32 %v3402_v63, %v3402_v63 }
 0x460   :  { %v1693_v12 = vsel %vm101_vm0, %v1677_v49, 0.0 }
 0x461   :  { %1715 = vadd.xlane.f32.xlu2 %v1693_v12 }
 0x463   :  { %v1648_v38 = vpop.f32.mrf.mxu2 }
 0x464   :  { %v3409_v41 = vadd.f32 %v3364_v31, %v1648_v38 }
 0x466   :  { %v1678_v1 = vmul.f32 %v3409_v41, %v3409_v41 }
 0x468   :  { %v1694_v5 = vsel %vm101_vm0, %v1678_v1, 0.0  ;;  %v1671_v1 = vmul.f32 %v3486_v44, %v3486_v44 }
 0x469   :  { %1717 = vadd.xlane.f32.xlu1 %v1694_v5 }
 0x46a   :  { %v1687_v7 = vsel %vm101_vm0, %v1671_v1, 0.0 }
 0x475   :  { %v1472_v16 = vpop.permute.xlu1 %1471 }
 0x476   :  { %v1489_v25 = vmul.f32 %v1472_v16, %v1217_v53 }
 0x478   :  { %v1509_v59 = vmul.f32 %v3292_v3, %v1489_v25 }
 0x47a   :  { %v1529_v48 = vadd.f32 %v3301_v8, %v1509_v59 }
 0x47c   :  { %v1545_v10 = vmax.f32 %v1529_v48, 0.0 }
 0x47e   :  { %v1553_v43 = vpack.c.bf16 %v1545_v10, %v1544_v18 }
 0x480   :  { %1665 = vmatmul.bf16.gmra.mxu2 %v1553_v43 }
 0x48a   :  { %v3472_v2 = vpop.xlane.xlu0 %1709 }
 0x48b   :  { %v1651_v42 = vpop.f32.mrf.mxu2 }
 0x48c   :  { %v3422_v37 = vadd.f32 %v3364_v31, %v1651_v42 }
 0x48e   :  { %v1679_v32 = vmul.f32 %v3422_v37, %v3422_v37  ;;  %v3504_v61 = vmul.f32 0.01, %v3422_v37 }
 0x490   :  { %v1695_v17 = vsel %vm101_vm0, %v1679_v32, 0.0  ;;  %v1775_v53 = vmul.f32 %v3504_v61, %v3504_v61 }
 0x491   :  { %1719 = vadd.xlane.f32.xlu1 %v1695_v17 }
 0x493   :  { %v1653_v3 = vpop.f32.mrf.mxu2 }
 0x494   :  { %v3429_v50 = vadd.f32 %v3364_v31, %v1653_v3 }
 0x496   :  { %v1680_v8 = vmul.f32 %v3429_v50, %v3429_v50 }
 0x498   :  { %v1696_v13 = vsel %vm101_vm0, %v1680_v8, 0.0 }
 0x499   :  { %1721 = vadd.xlane.f32.xlu0 %v1696_v13 }
 0x49b   :  { %v1656_v26 = vpop.f32.mrf.mxu2 }
 0x49c   :  { %v3436_v0 = vadd.f32 %v3364_v31, %v1656_v26 }
 0x49e   :  { %v1681_v27 = vmul.f32 %v3436_v0, %v3436_v0  ;;  %v1745_v55 = vmul.f32 0.01, %v3436_v0 }
 0x4a0   :  { %v1697_v20 = vsel %vm101_vm0, %v1681_v27, 0.0  ;;  %v3482_v6 = vpop.xlane.xlu1 %1707  ;;  %v1777_v3 = vmul.f32 %v1745_v55, %v1745_v55 }
 0x4a1   :  { %1723 = vadd.xlane.f32.xlu0 %v1697_v20 }
 0x4a3   :  { %v1658_v15 = vpop.f32.mrf.mxu2 }
 0x4a4   :  { %v3443_v33 = vadd.f32 %v3364_v31, %v1658_v15 }
 0x4a6   :  { %v1682_v35 = vmul.f32 %v3443_v33, %v3443_v33  ;;  %v1746_v45 = vmul.f32 0.01, %v3443_v33 }
 0x4a8   :  { %v1698_v23 = vsel %vm101_vm0, %v1682_v35, 0.0  ;;  %v1778_v25 = vmul.f32 %v1746_v45, %v1746_v45 }
 0x4a9   :  { %1725 = vadd.xlane.f32.xlu2 %v1698_v23 }
 0x4ab   :  { %v1661_v36 = vpop.f32.mrf.mxu2 }
 0x4ac   :  { %v3450_v9 = vadd.f32 %v3364_v31, %v1661_v36 }
 0x4ae   :  { %v1683_v28 = vmul.f32 %v3450_v9, %v3450_v9  ;;  %v3510_v42 = vmul.f32 0.01, %v3450_v9 }
 0x4b0   :  { %v1699_v54 = vsel %vm101_vm0, %v1683_v28, 0.0  ;;  %v1779_v20 = vmul.f32 %v3510_v42, %v3510_v42 }
 0x4b1   :  { %1727 = vadd.xlane.f32.xlu1 %v1699_v54 }
 0x4b3   :  { %v1663_v34 = vpop.f32.mrf.mxu2 }
 0x4b4   :  { %v3461_v39 = vadd.f32 %v3364_v31, %v1663_v34 }
 0x4b6   :  { %v1684_v62 = vmul.f32 %v3461_v39, %v3461_v39 }
 0x4b8   :  { %v1700_v52 = vsel %vm101_vm0, %v1684_v62, 0.0 }
 0x4b9   :  { %1729 = vadd.xlane.f32.xlu2 %v1700_v52  ;;  %1705 = vadd.xlane.f32.xlu1 %v1688_v22 }
 0x4c4   :  { %v3491_v38 = vpop.xlane.xlu0 %1711 }
 0x4cc   :  { %v1714_v12 = vpop.xlane.xlu2 %1713 }
 0x4d2   :  { %1872 = vperm.xlu1 %2442, %v1746_v45  }
 0x4d4   :  { %v3501_v24 = vpop.xlane.xlu2 %1715 }
 0x4dc   :  { %v3495_v5 = vpop.xlane.xlu1 %1717 }
 0x503   :  { %v1666_v40 = vpop.f32.mrf.mxu2 }
 0x504   :  { %v3475_v57 = vadd.f32 %v3364_v31, %v1666_v40  ;;  %v1720_v21 = vpop.xlane.xlu1 %1719 }
 0x505   :  { %v1759_v11 = vmul.f32 0.01, %v1720_v21  ;;  %v3535_v21 = vmul.f32 0.01, %v3395_v56 }
 0x506   :  { %v3478_v60 = vmul.f32 0.01, %v3475_v57  ;;  %v1685_v30 = vmul.f32 %v3475_v57, %v3475_v57 }
 0x507   :  { %v1791_v48 = vsub.f32 %v1759_v11, %v1775_v53 }
 0x508   :  { %1887 = vperm.xlu0 %2443, %v3478_v60   ;;  %v1701_v49 = vsel %vm101_vm0, %v1685_v30, 0.0 }
 0x509   :  { %1731 = vadd.xlane.f32.xlu2 %v1701_v49  ;;  %v1807_v17 = vmax.f32 %v1791_v48, 0.0 }
 0x50b   :  { %v1668_v10 = vpop.f32.mrf.mxu2  ;;  %v3520_v35 = vadd.f32 1e-05, %v1807_v17 }
 0x50c   :  { %v3499_v51 = vpop.xlane.xlu0 %1721  ;;  %v3513_v8 = vadd.f32 %v3364_v31, %v1668_v10  ;;  %v1748_v31 = vmul.f32 0.01, %v3461_v39  ;;  %v1772_v10 = vmul.f32 %v3535_v21, %v3535_v21 }
 0x50d   :  { %vm2013_vm13 = vweird.f32 %v3520_v35 }
 0x50e   :  { %v3523_v36 = vmul.f32 0.01, %v3513_v8  ;;  %v1780_v45 = vmul.f32 %v1748_v31, %v1748_v31  ;;  %v1686_v30 = vmul.f32 %v3513_v8, %v3513_v8 }
 0x510   :  { %v1702_v53 = vsel %vm101_vm0, %v1686_v30, 0.0 }
 0x511   :  { %1703 = vadd.xlane.f32.xlu2 %v1687_v7 }
 0x514   :  { %v1724_v16 = vpop.xlane.xlu0 %1723 }
 0x515   :  { %v1761_v43 = vmul.f32 0.01, %v1724_v16  ;;  %v1756_v16 = vmul.f32 0.01, %v1714_v12 }
 0x517   :  { %v1793_v26 = vsub.f32 %v1761_v43, %v1777_v3  ;;  %v1788_v17 = vsub.f32 %v1756_v16, %v1772_v10 }
 0x519   :  { %v1809_v28 = vmax.f32 %v1793_v26, 0.0 }
 0x51b   :  { %v3528_v62 = vadd.f32 1e-05, %v1809_v28 }
 0x51c   :  { %v1726_v4 = vpop.xlane.xlu2 %1725 }
 0x51d   :  { %v1762_v59 = vmul.f32 0.01, %v1726_v4  ;;  %vm2033_vm1 = vweird.f32 %v3528_v62 }
 0x51f   :  { %v1794_v18 = vsub.f32 %v1762_v59, %v1778_v25 }
 0x521   :  { %v1810_v32 = vmax.f32 %v1794_v18, 0.0 }
 0x523   :  { %v3515_v13 = vadd.f32 1e-05, %v1810_v32 }
 0x524   :  { %v1728_v27 = vpop.xlane.xlu1 %1727 }
 0x525   :  { %2520 = vrsqrt.f32 %v3515_v13  ;;  %v1763_v15 = vmul.f32 0.01, %v1728_v27  ;;  %v3546_v27 = vmul.f32 0.01, %v3381_v47  ;;  %vm2043_vm10 = vweird.f32 %v3515_v13 }
 0x526   :  { %2522 = vrsqrt.f32 %v3520_v35 }
 0x527   :  { %v1795_v23 = vsub.f32 %v1763_v15, %v1779_v20  ;;  %v1753_v15 = vmul.f32 0.01, %v3482_v6 }
 0x529   :  { %v1811_v54 = vmax.f32 %v1795_v23, 0.0  ;;  %1892 = vperm.xlu2 %2444, %v3523_v36   ;;  %v1804_v23 = vmax.f32 %v1788_v17, 0.0 }
 0x52b   :  { %v2521_v34 = vpop.eup %2520  ;;  %v1923_v58 = vadd.f32 1e-05, %v1811_v54  ;;  %v1916_v30 = vadd.f32 1e-05, %v1804_v23 }
 0x52c   :  { %v2038_v52 = vmul.f32 %v2521_v34, %v3515_v13  ;;  %v1730_v22 = vpop.xlane.xlu2 %1729  ;;  %v2523_v1 = vpop.eup %2522  ;;  %vm2044_vm8 = vweird.f32 %v2521_v34 }
 0x52d   :  { %2524 = vrsqrt.f32 %v1923_v58  ;;  %v1764_v40 = vmul.f32 0.01, %v1730_v22  ;;  %v2008_v25 = vmul.f32 %v2523_v1, %v3520_v35  ;;  %vm2053_vm7 = vweird.f32 %v1923_v58  ;;  %vm2045_vm11 = vmor %vm2043_vm10, %vm2044_vm8 }
 0x52e   :  { %2526 = vrsqrt.f32 %v3528_v62  ;;  %v2039_v7 = vmul.f32 %v2521_v34, %v2038_v52  ;;  %v1769_v52 = vmul.f32 %v3546_v27, %v3546_v27  ;;  %vm2014_vm12 = vweird.f32 %v2523_v1 }
 0x52f   :  { %v1796_v49 = vsub.f32 %v1764_v40, %v1780_v45  ;;  %v2009_v3 = vmul.f32 %v2523_v1, %v2008_v25  ;;  %vm2015_vm14 = vmor %vm2013_vm13, %vm2014_vm12 }
 0x530   :  { %v2040_v18 = vmul.f32 0.5, %v2039_v7 }
 0x531   :  { %v1812_v11 = vmax.f32 %v1796_v49, 0.0  ;;  %1882 = vperm.xlu2 %2444, %v1748_v31   ;;  %v2010_v28 = vmul.f32 0.5, %v2009_v3 }
 0x532   :  { %1733 = vadd.xlane.f32.xlu0 %v1702_v53  ;;  %v2041_v26 = vsub.f32 1.5, %v2040_v18 }
 0x533   :  { %v2525_v4 = vpop.eup %2524  ;;  %v3540_v48 = vadd.f32 1e-05, %v1812_v11  ;;  %v2011_v49 = vsub.f32 1.5, %v2010_v28 }
 0x534   :  { %v2048_v59 = vmul.f32 %v2525_v4, %v1923_v58  ;;  %v2527_v43 = vpop.eup %2526  ;;  %vm2054_vm0 = vweird.f32 %v2525_v4  ;;  %v2042_v54 = vmul.f32 %v2521_v34, %v2041_v26 }
 0x535   :  { %2528 = vrsqrt.f32 %v3540_v48  ;;  %v2028_v12 = vmul.f32 %v2527_v43, %v3528_v62  ;;  %vm2055_vm9 = vmor %vm2053_vm7, %vm2054_vm0  ;;  %v2012_v53 = vmul.f32 %v2523_v1, %v2011_v49  ;;  %vm2034_vm15 = vweird.f32 %v2527_v43 }
 0x536   :  { %v2049_v32 = vmul.f32 %v2525_v4, %v2048_v59  ;;  %v2046_v6 = vsel %vm2045_vm11, %v2521_v34, %v2042_v54  ;;  %2530 = vrsqrt.f32 %v1916_v30  ;;  %vm2035_vm2 = vmor %vm2033_vm1, %vm2034_vm15  ;;  %vm2063_vm4 = vweird.f32 %v3540_v48 }
 0x537   :  { %v2029_v22 = vmul.f32 %v2527_v43, %v2028_v12  ;;  %vm1983_vm0 = vweird.f32 %v1916_v30 }
 0x538   :  { %v2050_v19 = vmul.f32 0.5, %v2049_v32 }
 0x539   :  { %1867 = vperm.xlu2 %2444, %v1745_v55   ;;  %v1785_v55 = vsub.f32 %v1753_v15, %v1769_v52  ;;  %v2030_v58 = vmul.f32 0.5, %v2029_v22  ;;  %v3567_v52 = vmul.f32 0.01, %v3456_v29  ;;  %v3571_v22 = vmul.f32 0.01, %v3429_v50 }
 0x53a   :  { %v2051_v20 = vsub.f32 1.5, %v2050_v19 }
 0x53b   :  { %v2529_v45 = vpop.eup %2528  ;;  %v1801_v11 = vmax.f32 %v1785_v55, 0.0  ;;  %v2031_v16 = vsub.f32 1.5, %v2030_v58 }
 0x53c   :  { %v2052_v31 = vmul.f32 %v2525_v4, %v2051_v20  ;;  %v2058_v7 = vmul.f32 %v2529_v45, %v3540_v48  ;;  %v2531_v59 = vpop.eup %2530  ;;  %vm2064_vm3 = vweird.f32 %v2529_v45 }
 0x53d   :  { %v1913_v13 = vadd.f32 1e-05, %v1801_v11  ;;  %v2032_v34 = vmul.f32 %v2527_v43, %v2031_v16  ;;  %v1978_v10 = vmul.f32 %v2531_v59, %v1916_v30  ;;  %vm2065_vm5 = vmor %vm2063_vm4, %vm2064_vm3  ;;  %vm1984_vm6 = vweird.f32 %v2531_v59 }
 0x53e   :  { %v2056_v40 = vsel %vm2055_vm9, %v2525_v4, %v2052_v31  ;;  %v2059_v25 = vmul.f32 %v2529_v45, %v2058_v7  ;;  %v2016_v4 = vsel %vm2015_vm14, %v2523_v1, %v2012_v53  ;;  %vm1985_vm7 = vmor %vm1983_vm0, %vm1984_vm6  ;;  %v3579_v7 = vmul.f32 0.01, %v3402_v63 }
 0x53f   :  { %2149 = vperm.xlu1 %2442, %v2056_v40   ;;  %2532 = vrsqrt.f32 %v1913_v13  ;;  %v2036_v32 = vsel %vm2035_vm2, %v2527_v43, %v2032_v34  ;;  %v1979_v35 = vmul.f32 %v2531_v59, %v1978_v10  ;;  %v3563_v43 = vmul.f32 0.01, %v3388_v14 }
 0x540   :  { %v2060_v18 = vmul.f32 0.5, %v2059_v25  ;;  %vm1953_vm9 = vweird.f32 %v1913_v13  ;;  %v1776_v40 = vmul.f32 %v3571_v22, %v3571_v22  ;;  %v1757_v11 = vmul.f32 0.01, %v3501_v24 }
 0x541   :  { %2144 = vperm.xlu2 %2444, %v2046_v6   ;;  %v1980_v26 = vmul.f32 0.5, %v1979_v35  ;;  %v1781_v6 = vmul.f32 %v3478_v60, %v3478_v60 }
 0x542   :  { %v2061_v17 = vsub.f32 1.5, %v2060_v18 }
 0x543   :  { %v1981_v12 = vsub.f32 1.5, %v1980_v26 }
 0x544   :  { %v2062_v1 = vmul.f32 %v2529_v45, %v2061_v17 }
 0x545   :  { %v2533_v3 = vpop.eup %2532  ;;  %v1982_v15 = vmul.f32 %v2531_v59, %v1981_v12  ;;  %v1754_v12 = vmul.f32 0.01, %v3472_v2 }
 0x546   :  { %1877 = vperm.xlu0 %2443, %v3510_v42   ;;  %v3558_v42 = vmul.f32 0.01, %v3409_v41  ;;  %v1948_v19 = vmul.f32 %v2533_v3, %v1913_v13  ;;  %v2066_v62 = vsel %vm2065_vm5, %v2529_v45, %v2062_v1  ;;  %vm1954_vm8 = vweird.f32 %v2533_v3 }
 0x547   :  { %v1986_v28 = vsel %vm1985_vm7, %v2531_v59, %v1982_v15  ;;  %vm1955_vm10 = vmor %vm1953_vm9, %vm1954_vm8  ;;  %v1760_v45 = vmul.f32 0.01, %v3499_v51  ;;  %v1773_v51 = vmul.f32 %v3579_v7, %v3579_v7 }
 0x548   :  { %v1949_v20 = vmul.f32 %v2533_v3, %v1948_v19 }
 0x549   :  { %2129 = vperm.xlu2 %2444, %v2016_v4   ;;  %v1792_v30 = vsub.f32 %v1760_v45, %v1776_v40  ;;  %v1789_v13 = vsub.f32 %v1757_v11, %v1773_v51  ;;  %v3593_v40 = vmul.f32 0.01, %v3486_v44 }
 0x54a   :  { %v1950_v23 = vmul.f32 0.5, %v1949_v20 }
 0x54b   :  { %v1808_v53 = vmax.f32 %v1792_v30, 0.0  ;;  %v1805_v59 = vmax.f32 %v1789_v13, 0.0 }
 0x54c   :  { %v1951_v31 = vsub.f32 1.5, %v1950_v23 }
 0x54d   :  { %v1920_v4 = vadd.f32 1e-05, %v1808_v53  ;;  %v1917_v18 = vadd.f32 1e-05, %v1805_v59 }
 0x54e   :  { %2139 = vperm.xlu0 %2443, %v2036_v32   ;;  %v1952_v48 = vmul.f32 %v2533_v3, %v1951_v31 }
 0x54f   :  { %vm2023_vm15 = vweird.f32 %v1920_v4  ;;  %vm1993_vm3 = vweird.f32 %v1917_v18 }
 0x550   :  { %v1956_v54 = vsel %vm1955_vm10, %v2533_v3, %v1952_v48 }
 0x551   :  { %1852 = vperm.xlu2 %2444, %v3558_v42  }
 0x556   :  { %2154 = vperm.xlu0 %2443, %v2066_v62   ;;  %v3585_v62 = vmul.f32 0.01, %v3368_v46 }
 0x558   :  { %v1770_v23 = vmul.f32 %v3585_v62, %v3585_v62 }
 0x559   :  { %1837 = vperm.xlu2 %2444, %v3563_v43  }
 0x561   :  { %2114 = vperm.xlu2 %2444, %v1986_v28   ;;  %v1786_v28 = vsub.f32 %v1754_v12, %v1770_v23  ;;  %v1771_v12 = vmul.f32 %v3563_v43, %v3563_v43 }
 0x569   :  { %2099 = vperm.xlu2 %2444, %v1956_v54  }
 0x571   :  { %1822 = vperm.xlu2 %2444, %v3567_v52  }
 0x57a   :  { %v3590_v31 = vpop.permute.xlu0 %1887 }
 0x57c   :  { %v1732_v55 = vpop.xlane.xlu2 %1731 }
 0x57d   :  { %v1765_v49 = vmul.f32 0.01, %v1732_v55  ;;  %v1802_v55 = vmax.f32 %v1786_v28, 0.0 }
 0x57f   :  { %v1797_v58 = vsub.f32 %v1765_v49, %v1781_v6  ;;  %v1767_v49 = vmul.f32 %v3593_v40, %v3593_v40 }
 0x581   :  { %v1813_v16 = vmax.f32 %v1797_v58, 0.0  ;;  %v1914_v58 = vadd.f32 1e-05, %v1802_v55 }
 0x583   :  { %v1925_v25 = vadd.f32 1e-05, %v1813_v16  ;;  %v1782_v16 = vmul.f32 %v3523_v36, %v3523_v36  ;;  %vm1963_vm8 = vweird.f32 %v1914_v58 }
 0x584   :  { %v1704_v48 = vpop.xlane.xlu2 %1703 }
 0x585   :  { %2534 = vrsqrt.f32 %v1925_v25  ;;  %vm2073_vm12 = vweird.f32 %v1925_v25  ;;  %v1751_v30 = vmul.f32 0.01, %v1704_v48 }
 0x586   :  { %2536 = vrsqrt.f32 %v1920_v4 }
 0x587   :  { %2538 = vrsqrt.f32 %v1917_v18  ;;  %v1783_v11 = vsub.f32 %v1751_v30, %v1767_v49 }
 0x588   :  { %2540 = vrsqrt.f32 %v1914_v58 }
 0x589   :  { %v1799_v59 = vmax.f32 %v1783_v11, 0.0 }
 0x58b   :  { %v2535_v34 = vpop.eup %2534 }
 0x58c   :  { %v2068_v60 = vmul.f32 %v2535_v34, %v1925_v25  ;;  %v2537_v32 = vpop.eup %2536  ;;  %vm2074_vm11 = vweird.f32 %v2535_v34 }
 0x58d   :  { %v2018_v35 = vmul.f32 %v2537_v32, %v1920_v4  ;;  %vm2075_vm13 = vmor %vm2073_vm12, %vm2074_vm11  ;;  %v2539_v26 = vpop.eup %2538  ;;  %vm2024_vm14 = vweird.f32 %v2537_v32  ;;  %v1774_v4 = vmul.f32 %v3558_v42, %v3558_v42 }
 0x58e   :  { %v2069_v10 = vmul.f32 %v2535_v34, %v2068_v60  ;;  %v1988_v20 = vmul.f32 %v2539_v26, %v1917_v18  ;;  %vm2025_vm1 = vmor %vm2023_vm15, %vm2024_vm14  ;;  %vm1994_vm2 = vweird.f32 %v2539_v26 }
 0x58f   :  { %v2019_v19 = vmul.f32 %v2537_v32, %v2018_v35  ;;  %v1911_v35 = vadd.f32 1e-05, %v1799_v59  ;;  %vm1995_vm4 = vmor %vm1993_vm3, %vm1994_vm2 }
 0x590   :  { %v2070_v17 = vmul.f32 0.5, %v2069_v10  ;;  %v1989_v45 = vmul.f32 %v2539_v26, %v1988_v20 }
 0x591   :  { %v2020_v15 = vmul.f32 0.5, %v2019_v19  ;;  %vm1933_vm11 = vweird.f32 %v1911_v35 }
 0x592   :  { %v2071_v24 = vsub.f32 1.5, %v2070_v17  ;;  %v1990_v2 = vmul.f32 0.5, %v1989_v45 }
 0x593   :  { %v2021_v54 = vsub.f32 1.5, %v2020_v15 }
 0x594   :  { %v2072_v3 = vmul.f32 %v2535_v34, %v2071_v24  ;;  %v1991_v13 = vsub.f32 1.5, %v1990_v2  ;;  %v2541_v24 = vpop.eup %2540 }
 0x595   :  { %v2022_v6 = vmul.f32 %v2537_v32, %v2021_v54  ;;  %vm1964_vm7 = vweird.f32 %v2541_v24 }
 0x596   :  { %v2076_v1 = vsel %vm2075_vm13, %v2535_v34, %v2072_v3  ;;  %v1758_v34 = vmul.f32 0.01, %v3495_v5  ;;  %v1992_v10 = vmul.f32 %v2539_v26, %v1991_v13  ;;  %v1958_v3 = vmul.f32 %v2541_v24, %v1914_v58  ;;  %vm1965_vm9 = vmor %vm1963_vm8, %vm1964_vm7 }
 0x597   :  { %2159 = vperm.xlu1 %2442, %v2076_v1   ;;  %v2026_v25 = vsel %vm2025_vm1, %v2537_v32, %v2022_v6  ;;  %v1755_v1 = vmul.f32 0.01, %v3491_v38 }
 0x598   :  { %v1790_v36 = vsub.f32 %v1758_v34, %v1774_v4  ;;  %v1996_v32 = vsel %vm1995_vm4, %v2539_v26, %v1992_v10  ;;  %v1959_v18 = vmul.f32 %v2541_v24, %v1958_v3  ;;  %v1768_v10 = vmul.f32 %v3567_v52, %v3567_v52 }
 0x599   :  { %v1787_v42 = vsub.f32 %v1755_v1, %v1771_v12 }
 0x59a   :  { %v1806_v5 = vmax.f32 %v1790_v36, 0.0  ;;  %v1960_v45 = vmul.f32 0.5, %v1959_v18 }
 0x59b   :  { %v1803_v48 = vmax.f32 %v1787_v42, 0.0 }
 0x59c   :  { %v1918_v15 = vadd.f32 1e-05, %v1806_v5  ;;  %v1961_v43 = vsub.f32 1.5, %v1960_v45 }
 0x59d   :  { %v1915_v30 = vadd.f32 1e-05, %v1803_v48 }
 0x59e   :  { %vm2003_vm14 = vweird.f32 %v1918_v15 }
 0x59f   :  { %1857 = vperm.xlu1 %2442, %v3504_v61   ;;  %vm1973_vm2 = vweird.f32 %v1915_v30 }
 0x5a5   :  { %v1734_v53 = vpop.xlane.xlu0 %1733 }
 0x5a6   :  { %v1766_v51 = vmul.f32 0.01, %v1734_v53 }
 0x5a7   :  { %2134 = vperm.xlu1 %2442, %v2026_v25   ;;  %v1706_v25 = vpop.xlane.xlu1 %1705 }
 0x5a8   :  { %v1798_v61 = vsub.f32 %v1766_v51, %v1782_v16  ;;  %v1752_v59 = vmul.f32 0.01, %v1706_v25 }
 0x5aa   :  { %v1814_v60 = vmax.f32 %v1798_v61, 0.0  ;;  %v1784_v58 = vsub.f32 %v1752_v59, %v1768_v10 }
 0x5ac   :  { %v1926_v17 = vadd.f32 1e-05, %v1814_v60 }
 0x5ae   :  { %2542 = vrsqrt.f32 %v1926_v17  ;;  %vm2083_vm6 = vweird.f32 %v1926_v17 }
 0x5af   :  { %2119 = vperm.xlu1 %2442, %v1996_v32   ;;  %2544 = vrsqrt.f32 %v1911_v35  ;;  %v1800_v32 = vmax.f32 %v1784_v58, 0.0 }
 0x5b0   :  { %2546 = vrsqrt.f32 %v1918_v15 }
 0x5b1   :  { %2548 = vrsqrt.f32 %v1915_v30  ;;  %v1912_v3 = vadd.f32 1e-05, %v1800_v32 }
 0x5b3   :  { %2550 = vrsqrt.f32 %v1912_v3 }
 0x5b4   :  { %v2543_v19 = vpop.eup %2542 }
 0x5b5   :  { %v2078_v20 = vmul.f32 %v2543_v19, %v1926_v17  ;;  %v2545_v23 = vpop.eup %2544  ;;  %vm2084_vm5 = vweird.f32 %v2543_v19 }
 0x5b6   :  { %v1928_v54 = vmul.f32 %v2545_v23, %v1911_v35  ;;  %vm2085_vm0 = vmor %vm2083_vm6, %vm2084_vm5  ;;  %v2547_v49 = vpop.eup %2546  ;;  %vm1934_vm10 = vweird.f32 %v2545_v23  ;;  %vm1943_vm5 = vweird.f32 %v1912_v3 }
 0x5b7   :  { %1842 = vperm.xlu1 %2442, %v3535_v21   ;;  %v2079_v28 = vmul.f32 %v2543_v19, %v2078_v20  ;;  %v1962_v21 = vmul.f32 %v2541_v24, %v1961_v43  ;;  %v1998_v53 = vmul.f32 %v2547_v49, %v1918_v15  ;;  %v2549_v61 = vpop.eup %2548  ;;  %vm1935_vm12 = vmor %vm1933_vm11, %vm1934_vm10  ;;  %vm2004_vm13 = vweird.f32 %v2547_v49 }
 0x5b8   :  { %v1929_v6 = vmul.f32 %v2545_v23, %v1928_v54  ;;  %v1968_v34 = vmul.f32 %v2549_v61, %v1915_v30  ;;  %vm2005_vm15 = vmor %vm2003_vm14, %vm2004_vm13  ;;  %vm1974_vm1 = vweird.f32 %v2549_v61  ;;  %v1878_v54 = vpop.permute.xlu0 %1877 }
 0x5b9   :  { %v2080_v26 = vmul.f32 0.5, %v2079_v28  ;;  %v1966_v16 = vsel %vm1965_vm9, %v2541_v24, %v1962_v21  ;;  %v1999_v13 = vmul.f32 %v2547_v49, %v1998_v53  ;;  %vm1975_vm3 = vmor %vm1973_vm2, %vm1974_vm1  ;;  %v1873_v28 = vpop.permute.xlu1 %1872 }
 0x5ba   :  { %v1930_v11 = vmul.f32 0.5, %v1929_v6  ;;  %v1969_v36 = vmul.f32 %v2549_v61, %v1968_v34 }
 0x5bb   :  { %v2081_v55 = vsub.f32 1.5, %v2080_v26  ;;  %v2000_v60 = vmul.f32 0.5, %v1999_v13 }
 0x5bc   :  { %v1931_v51 = vsub.f32 1.5, %v1930_v11  ;;  %v1907_v11 = vsub.f32 %v3450_v9, %v1878_v54 }
 0x5bd   :  { %v2082_v38 = vmul.f32 %v2543_v19, %v2081_v55  ;;  %v2001_v17 = vsub.f32 1.5, %v2000_v60 }
 0x5bf   :  { %1827 = vperm.xlu1 %2442, %v3546_v27   ;;  %v2086_v2 = vsel %vm2085_vm0, %v2543_v19, %v2082_v38  ;;  %v1932_v27 = vmul.f32 %v2545_v23, %v1931_v51  ;;  %v2002_v24 = vmul.f32 %v2547_v49, %v2001_v17  ;;  %v2551_v19 = vpop.eup %2550 }
 0x5c0   :  { %2164 = vperm.xlu0 %2443, %v2086_v2   ;;  %v1938_v12 = vmul.f32 %v2551_v19, %v1912_v3  ;;  %vm1944_vm4 = vweird.f32 %v2551_v19  ;;  %v2140_v38 = vpop.permute.xlu0 %2139  ;;  %v3619_v2 = vld [vmem:[%s3690_s11] ss:$0 sm:$0xff] }
 0x5c1   :  { %v1936_v4 = vsel %vm1935_vm12, %v2545_v23, %v1932_v27  ;;  %v2006_v1 = vsel %vm2005_vm15, %v2547_v49, %v2002_v24  ;;  %vm1945_vm6 = vmor %vm1943_vm5, %vm1944_vm4  ;;  %v1893_v23 = vpop.permute.xlu2 %1892  ;;  %v2150_v48 = vpop.permute.xlu1 %2149 }
 0x5c2   :  { %v1910_v49 = vsub.f32 %v3513_v8, %v1893_v23 }
 0x5c7   :  { %2104 = vperm.xlu1 %2442, %v1966_v16  }
 0x5c8   :  { %1862 = vperm.xlu0 %2443, %v3571_v22   ;;  %v1970_v22 = vmul.f32 0.5, %v1969_v36  ;;  %v2155_v43 = vpop.permute.xlu0 %2154 }
 0x5c9   :  { %v1883_v26 = vpop.permute.xlu2 %1882 }
 0x5ca   :  { %v1971_v5 = vsub.f32 1.5, %v1970_v22  ;;  %v1908_v21 = vsub.f32 %v3461_v39, %v1883_v26 }
 0x5cc   :  { %v1972_v52 = vmul.f32 %v2549_v61, %v1971_v5  ;;  %v2180_v25 = vmul.f32 %v2155_v43, %v1908_v21 }
 0x5ce   :  { %v1976_v35 = vsel %vm1975_vm3, %v2549_v61, %v1972_v52  ;;  %v2179_v61 = vmul.f32 %v2150_v48, %v1907_v11  ;;  %v2200_v39 = vmul.f32 %v3619_v2, %v2180_v25 }
 0x5cf   :  { %2089 = vperm.xlu1 %2442, %v1936_v4   ;;  %v1906_v4 = vsub.f32 %v3443_v33, %v1873_v28 }
 0x5d0   :  { %1847 = vperm.xlu0 %2443, %v3579_v7   ;;  %v1939_v7 = vmul.f32 %v2551_v19, %v1938_v12  ;;  %v2199_v34 = vmul.f32 %v3619_v2, %v2179_v61 }
 0x5d1   :  { %v1868_v55 = vpop.permute.xlu2 %1867 }
 0x5d2   :  { %v1940_v20 = vmul.f32 0.5, %v1939_v7  ;;  %v1905_v27 = vsub.f32 %v3436_v0, %v1868_v55 }
 0x5d4   :  { %v1941_v42 = vsub.f32 1.5, %v1940_v20  ;;  %v2177_v17 = vmul.f32 %v2140_v38, %v1905_v27 }
 0x5d6   :  { %v1942_v15 = vmul.f32 %v2551_v19, %v1941_v42  ;;  %v2197_v5 = vmul.f32 %v3619_v2, %v2177_v17  ;;  %v2248_v17 = vld [vmem:[#allocation2] sm:$0x1] }
 0x5d8   :  { %2124 = vperm.xlu0 %2443, %v2006_v1   ;;  %v1946_v18 = vsel %vm1945_vm6, %v2551_v19, %v1942_v15 }
 0x5e0   :  { %2109 = vperm.xlu0 %2443, %v1976_v35  }
 0x5e8   :  { %1832 = vperm.xlu0 %2443, %v3585_v62   ;;  %v2145_v62 = vpop.permute.xlu2 %2144 }
 0x5e9   :  { %v2178_v22 = vmul.f32 %v2145_v62, %v1906_v4 }
 0x5eb   :  { %v2198_v35 = vmul.f32 %v3619_v2, %v2178_v22  ;;  %v2634_v22 = vmov 0  }
 0x5ec   :  { %2445 = vset.pattern.permute.xlu2 %v2634_v22 }
 0x5ed   :  { %2251 = vperm.xlu2 %2445, %v2248_v17  }
 0x5f0   :  { %1817 = vperm.xlu0 %2443, %v3593_v40   ;;  %v1909_v40 = vsub.f32 %v3475_v57, %v3590_v31  ;;  %v3628_v57 = vld [vmem:[%s3691_s12] ss:$0 sm:$0xff]  ;;  %v2130_v31 = vpop.permute.xlu2 %2129 }
 0x5f1   :  { %v2220_v32 = vadd.f32 %v3628_v57, %v2200_v39  ;;  %v2219_v3 = vadd.f32 %v3628_v57, %v2199_v34  ;;  %v2217_v42 = vadd.f32 %v3628_v57, %v2197_v5 }
 0x5f3   :  { %v2236_v52 = vmax.f32 %v2220_v32, 0.0  ;;  %v2235_v33 = vmax.f32 %v2219_v3, 0.0  ;;  %v2233_v26 = vmax.f32 %v2217_v42, 0.0 }
 0x5f5   :  { %v2245_v20 = vpack.c.bf16 %v2236_v52, %v2235_v33 }
 0x5f8   :  { %2094 = vperm.xlu0 %2443, %v1946_v18   ;;  %v1853_v1 = vpop.permute.xlu2 %1852  ;;  %v2218_v18 = vadd.f32 %v3628_v57, %v2198_v35 }
 0x5f9   :  { %v1902_v48 = vsub.f32 %v3409_v41, %v1853_v1 }
 0x600   :  { %2446 = vset.pattern.permute.xlu0 %v2634_v22 }
 0x609   :  { %v2160_v45 = vpop.permute.xlu1 %2159 }
 0x60a   :  { %v2181_v6 = vmul.f32 %v2160_v45, %v1909_v40  ;;  %v2234_v45 = vmax.f32 %v2218_v18, 0.0 }
 0x60c   :  { %v2201_v53 = vmul.f32 %v3619_v2, %v2181_v6 }
 0x60e   :  { %v2221_v8 = vadd.f32 %v3628_v57, %v2201_v53 }
 0x610   :  { %v2237_v60 = vmax.f32 %v2221_v8, 0.0 }
 0x611   :  { %v1858_v30 = vpop.permute.xlu1 %1857 }
 0x612   :  { %v1903_v19 = vsub.f32 %v3422_v37, %v1858_v30  ;;  %v2244_v30 = vpack.c.bf16 %v2234_v45, %v2233_v26 }
 0x614   :  { %v2175_v15 = vmul.f32 %v2130_v31, %v1903_v19 }
 0x616   :  { %v2195_v54 = vmul.f32 %v3619_v2, %v2175_v15 }
 0x618   :  { %v2215_v40 = vadd.f32 %v3628_v57, %v2195_v54 }
 0x619   :  { %v2135_v16 = vpop.permute.xlu1 %2134 }
 0x61a   :  { %v2231_v53 = vmax.f32 %v2215_v40, 0.0 }
 0x621   :  { %v2120_v24 = vpop.permute.xlu1 %2119 }
 0x629   :  { %v1843_v23 = vpop.permute.xlu1 %1842 }
 0x62a   :  { %v1900_v11 = vsub.f32 %v3395_v56, %v1843_v23 }
 0x631   :  { %v1828_v21 = vpop.permute.xlu1 %1827 }
 0x632   :  { %v2165_v51 = vpop.permute.xlu0 %2164  ;;  %v1897_v56 = vsub.f32 %v3381_v47, %v1828_v21 }
 0x633   :  { %v2182_v13 = vmul.f32 %v2165_v51, %v1910_v49 }
 0x635   :  { %v2202_v59 = vmul.f32 %v3619_v2, %v2182_v13 }
 0x637   :  { %v2222_v9 = vadd.f32 %v3628_v57, %v2202_v59 }
 0x639   :  { %v2238_v10 = vmax.f32 %v2222_v9, 0.0  ;;  %v2105_v27 = vpop.permute.xlu1 %2104 }
 0x63a   :  { %v1863_v58 = vpop.permute.xlu0 %1862 }
 0x63b   :  { %v2246_v36 = vpack.c.bf16 %v2238_v10, %v2237_v60  ;;  %v1904_v0 = vsub.f32 %v3429_v50, %v1863_v58  ;;  %v1838_v50 = vpop.permute.xlu2 %1837 }
 0x63c   :  { %v1899_v41 = vsub.f32 %v3388_v14, %v1838_v50 }
 0x63d   :  { %2255 = vmatpush.bf16.xpose.msra.mxu3 %v2246_v36  ;;  %v2176_v7 = vmul.f32 %v2135_v16, %v1904_v0 }
 0x63f   :  { %v2196_v28 = vmul.f32 %v3619_v2, %v2176_v7 }
 0x641   :  { %v2216_v62 = vadd.f32 %v3628_v57, %v2196_v28  ;;  %v2090_v19 = vpop.permute.xlu1 %2089 }
 0x642   :  { %v1848_v12 = vpop.permute.xlu0 %1847 }
 0x643   :  { %v1901_v37 = vsub.f32 %v3402_v63, %v1848_v12  ;;  %v2232_v49 = vmax.f32 %v2216_v62, 0.0  ;;  %v2115_v16 = vpop.permute.xlu2 %2114 }
 0x644   :  { %v2172_v61 = vmul.f32 %v2115_v16, %v1900_v11 }
 0x645   :  { %2256 = vmatpush.bf16.xpose.msra.mxu3 %v2245_v20  ;;  %v2173_v43 = vmul.f32 %v2120_v24, %v1901_v37  ;;  %v2243_v13 = vpack.c.bf16 %v2232_v49, %v2231_v53 }
 0x646   :  { %v2192_v14 = vmul.f32 %v3619_v2, %v2172_v61 }
 0x647   :  { %v2193_v63 = vmul.f32 %v3619_v2, %v2173_v43 }
 0x648   :  { %v2212_v24 = vadd.f32 %v3628_v57, %v2192_v14 }
 0x649   :  { %v2213_v59 = vadd.f32 %v3628_v57, %v2193_v63 }
 0x64a   :  { %v2125_v55 = vpop.permute.xlu0 %2124 }
 0x64b   :  { %v2174_v38 = vmul.f32 %v2125_v55, %v1902_v48  ;;  %v2229_v9 = vmax.f32 %v2213_v59, 0.0  ;;  %v2100_v4 = vpop.permute.xlu2 %2099 }
 0x64c   :  { %v2169_v36 = vmul.f32 %v2100_v4, %v1897_v56 }
 0x64d   :  { %2257 = vmatpush.bf16.xpose.msra.mxu3 %v2244_v30  ;;  %v2194_v6 = vmul.f32 %v3619_v2, %v2174_v38 }
 0x64e   :  { %v2189_v1 = vmul.f32 %v3619_v2, %v2169_v36 }
 0x64f   :  { %v2214_v31 = vadd.f32 %v3628_v57, %v2194_v6 }
 0x650   :  { %v2209_v12 = vadd.f32 %v3628_v57, %v2189_v1 }
 0x651   :  { %v2230_v39 = vmax.f32 %v2214_v31, 0.0 }
 0x652   :  { %v2110_v51 = vpop.permute.xlu0 %2109  ;;  %v2225_v18 = vmax.f32 %v2209_v12, 0.0 }
 0x653   :  { %v2171_v25 = vmul.f32 %v2110_v51, %v1899_v41  ;;  %v2242_v10 = vpack.c.bf16 %v2230_v39, %v2229_v9  ;;  %v1823_v7 = vpop.permute.xlu2 %1822 }
 0x654   :  { %v1896_v42 = vsub.f32 %v3456_v29, %v1823_v7  ;;  %v2247_v29 = vld [vmem:[%s3692_s13] sm:$0x1] }
 0x655   :  { %2258 = vmatpush.bf16.xpose.msra.mxu3 %v2243_v13  ;;  %v2191_v8 = vmul.f32 %v3619_v2, %v2171_v25 }
 0x657   :  { %v2211_v58 = vadd.f32 %v3628_v57, %v2191_v8 }
 0x659   :  { %v2227_v3 = vmax.f32 %v2211_v58, 0.0 }
 0x65a   :  { %v1833_v34 = vpop.permute.xlu0 %1832 }
 0x65b   :  { %v1898_v60 = vsub.f32 %v3368_v46, %v1833_v34  ;;  %v2228_v46 = vmax.f32 %v2212_v24, 0.0  ;;  %v2252_v55 = vpop.permute.xlu2 %2251 }
 0x65c   :  { %v2254_v38 = vperm.slane %v2252_v55, 0 }
 0x65d   :  { %v2170_v32 = vmul.f32 %v2105_v27, %v1898_v60  ;;  %2259 = vmatpush.bf16.xpose.msra.mxu3 %v2242_v10  ;;  %v2241_v52 = vpack.c.bf16 %v2228_v46, %v2227_v3 }
 0x65f   :  { %v2190_v47 = vmul.f32 %v3619_v2, %v2170_v32 }
 0x661   :  { %v2210_v35 = vadd.f32 %v3628_v57, %v2190_v47 }
 0x662   :  { %v1818_v5 = vpop.permute.xlu0 %1817 }
 0x663   :  { %v1895_v0 = vsub.f32 %v3486_v44, %v1818_v5  ;;  %v2226_v20 = vmax.f32 %v2210_v35, 0.0 }
 0x665   :  { %v2167_v33 = vmul.f32 %v2090_v19, %v1895_v0  ;;  %2260 = vmatpush.bf16.xpose.msra.mxu3 %v2241_v52  ;;  %v2240_v26 = vpack.c.bf16 %v2226_v20, %v2225_v18 }
 0x667   :  { %v2187_v15 = vmul.f32 %v3619_v2, %v2167_v33 }
 0x669   :  { %v2207_v50 = vadd.f32 %v3628_v57, %v2187_v15 }
 0x66a   :  { %v2095_v23 = vpop.permute.xlu0 %2094 }
 0x66b   :  { %v2168_v28 = vmul.f32 %v2095_v23, %v1896_v42  ;;  %v2223_v54 = vmax.f32 %v2207_v50, 0.0 }
 0x66d   :  { %v2188_v44 = vmul.f32 %v3619_v2, %v2168_v28  ;;  %2261 = vmatpush.bf16.xpose.msra.mxu3 %v2240_v26 }
 0x66f   :  { %v2208_v48 = vadd.f32 %v3628_v57, %v2188_v44 }
 0x671   :  { %v2224_v37 = vmax.f32 %v2208_v48, 0.0 }
 0x673   :  { %v2239_v45 = vpack.c.bf16 %v2224_v37, %v2223_v54 }
 0x675   :  { %2262 = vmatpush.bf16.xpose.msra.mxu3 %v2239_v45 }
 0x67c   :  { %2263 = vmatmul.bf16.vlgmr.msra.gmra.mxu3 %v2247_v29 }
 0x6ff   :  { %v2264_v30 = vpop.f32.mrf.mxu3 }
 0x700   :  { %v2265_v62 = vadd.f32 %v2264_v30, %v2254_v38 }
 0x702   :  { %2268 = vst [vmem:[%s3694_s15] sm:$0x1] %v2265_v62 }
 0x707   :  { %v2266_v2 = vpop.f32.mrf.mxu3 }
 0x708   :  { %2273 = vsyncpa [#allocation4], 1 }
 0x709   :  { %2274 = vsyncpa [#allocation6], 1 }

</bundles_post_ra>
